<compile_context>
chip_gen: v7x
topology: tpu7x:2x2x1
jax: 0.10.0
libtpu: 0.0.40
codegen_flags: <defaults>
</compile_context>

<pallas_src>
import functools

import jax
import jax.numpy as jnp
from jax.experimental import pallas as pl
from jax.experimental.pallas import tpu as pltpu

IN_FEATURES = 28 * 28          # 784
HIDDEN = 512
OUT_FEATURES = 10
OUT_PADDED = 128               # lane-dense output width (unmasked stores)


def _round_up(x, m):
    return ((x + m - 1) // m) * m


def mlp_kernel(x_ref, w1_ref, b1_ref, w2_ref, b2_ref, w3_ref, b3_ref, o_ref):
    """Fused 3-layer MLP on one (tm, 784) batch tile; weights resident in VMEM.

    x arrives f32 and is cast to bf16 in-kernel (MXU inputs); all matmuls
    accumulate in f32 via preferred_element_type.  Bias-add + ReLU stay in
    f32 (safe on v5e's f32-only VPU).  Output stored bf16, 128 lanes wide.
    """
    x = x_ref[...].astype(jnp.bfloat16)                           # (tm, 784)

    h1 = jnp.dot(x, w1_ref[...], preferred_element_type=jnp.float32)
    h1 = jnp.maximum(h1 + b1_ref[...], 0.0)                       # ReLU, f32
    # Dropout(0.25): identity in eval mode.

    h2 = jnp.dot(h1.astype(jnp.bfloat16), w2_ref[...],
                 preferred_element_type=jnp.float32)
    h2 = jnp.maximum(h2 + b2_ref[...], 0.0)                       # ReLU, f32
    # Dropout(0.25): identity in eval mode.

    h3 = jnp.dot(h2.astype(jnp.bfloat16), w3_ref[...],
                 preferred_element_type=jnp.float32)
    o_ref[...] = jnp.maximum(h3 + b3_ref[...], 0.0).astype(o_ref.dtype)


def _choose_batch_tile(B, tm_max):
    """Pick (tm, n_tiles): tm a multiple of 8 (or == B for tiny batches),
    >= 2 tiles once B >= 16 so the parallel grid axis can occupy both v7x
    TensorCores, and no real batch padding (the last tile may be partial;
    its out-of-bounds rows are masked on writeback)."""
    n_tiles = max(-(-B // tm_max), 2 if B >= 16 else 1)
    tm = _round_up(-(-B // n_tiles), 8)
    if tm >= B:
        tm = B                      # single block == full batch (full-dim rule)
    return tm, pl.cdiv(B, tm)


@functools.partial(jax.jit, static_argnames=("tm_max",))
def mlp_forward(x_nchw, params, *, tm_max=512):
    """x_nchw: (B, 1, 28, 28) float32 -> logits (B, 10) float32."""
    w1, b1, w2, b2, w3, b3 = params
    B = x_nchw.shape[0]

    # nn.Flatten: contiguous reshape, metadata-only -- no extra HBM pass.
    x2d = x_nchw.reshape(B, IN_FEATURES)

    tm, n_tiles = _choose_batch_tile(B, tm_max)

    # Weights in bf16 (w3/b3 padded on N to 128 lanes); biases stay f32.
    # (~1.6 MB total -- negligible next to the activation traffic.)
    w1b = w1.astype(jnp.bfloat16)
    w2b = w2.astype(jnp.bfloat16)
    w3b = jnp.pad(w3, ((0, 0), (0, OUT_PADDED - OUT_FEATURES))).astype(jnp.bfloat16)
    b1p = b1.astype(jnp.float32)
    b2p = b2.astype(jnp.float32)
    b3p = jnp.pad(b3, ((0, 0), (0, OUT_PADDED - OUT_FEATURES))).astype(jnp.float32)

    resident = lambda shape: pl.BlockSpec(shape, lambda i: (0, 0))

    out = pl.pallas_call(
        mlp_kernel,
        out_shape=jax.ShapeDtypeStruct((B, OUT_PADDED), jnp.bfloat16),
        grid=(n_tiles,),
        in_specs=[
            pl.BlockSpec((tm, IN_FEATURES), lambda i: (i, 0)),     # x tile (f32)
            resident((IN_FEATURES, HIDDEN)),                       # w1
            resident((1, HIDDEN)),                                 # b1
            resident((HIDDEN, HIDDEN)),                            # w2
            resident((1, HIDDEN)),                                 # b2
            resident((HIDDEN, OUT_PADDED)),                        # w3
            resident((1, OUT_PADDED)),                             # b3
        ],
        out_specs=pl.BlockSpec((tm, OUT_PADDED), lambda i: (i, 0)),
        compiler_params=pltpu.CompilerParams(
            dimension_semantics=("parallel",),
            vmem_limit_bytes=32 * 1024 * 1024),
    )(x2d, w1b, b1p, w2b, b2p, w3b, b3p)

    return out[:, :OUT_FEATURES].astype(jnp.float32)


def init_params(key):
    """Deterministic init mimicking torch.nn.Linear defaults: U(-1/sqrt(fan_in), +)."""
    def linear(key, fan_in, fan_out):
        kw, kb = jax.random.split(key)
        bound = 1.0 / jnp.sqrt(fan_in)
        # Stored as (in, out) so the kernel computes x @ W (== x @ W_torch.T).
        w = jax.random.uniform(kw, (fan_in, fan_out), jnp.float32, -bound, bound)
        b = jax.random.uniform(kb, (1, fan_out), jnp.float32, -bound, bound)
        return w, b

    k1, k2, k3 = jax.random.split(key, 3)
    w1, b1 = linear(k1, IN_FEATURES, HIDDEN)
    w2, b2 = linear(k2, HIDDEN, HIDDEN)
    w3, b3 = linear(k3, HIDDEN, OUT_FEATURES)
    return (w1, b1, w2, b2, w3, b3)


def mlp_reference(x_nchw, params):
    """Pure-JAX f32 reference for correctness checking."""
    w1, b1, w2, b2, w3, b3 = params
    x = x_nchw.reshape(x_nchw.shape[0], -1)
    h = jnp.maximum(x @ w1 + b1, 0.0)
    h = jnp.maximum(h @ w2 + b2, 0.0)
    return jnp.maximum(h @ w3 + b3, 0.0)


if __name__ == "__main__":
    key = jax.random.PRNGKey(0)
    kx, kp = jax.random.split(key)

    # Small MNIST-like batch: (B, C, H, W) = (8, 1, 28, 28), NCHW like PyTorch.
    x = jax.random.normal(kx, (8, 1, 28, 28), dtype=jnp.float32)
    params = init_params(kp)

    out = mlp_forward(x, params)
    out = jax.block_until_ready(out)

    ref = mlp_reference(x, params)
    assert out.shape == (8, 10)
    # bf16 matmul inputs + bf16 output store -> looser tolerance vs f32 ref.
    assert jnp.allclose(out, ref, atol=3e-2, rtol=3e-2), "mismatch vs reference"

    print("KERNEL_OK")
</pallas_src>

<mosaic_0001>
module attributes {stable_mosaic.version = 11 : i64} {
  func.func @mlp_kernel(%arg0: i32, %arg1: memref<8x784xf32, #tpu.memory_space<vmem>>, %arg2: memref<784x512xbf16, #tpu.memory_space<vmem>>, %arg3: memref<1x512xf32, #tpu.memory_space<vmem>>, %arg4: memref<512x512xbf16, #tpu.memory_space<vmem>>, %arg5: memref<1x512xf32, #tpu.memory_space<vmem>>, %arg6: memref<512x128xbf16, #tpu.memory_space<vmem>>, %arg7: memref<1x128xf32, #tpu.memory_space<vmem>>, %arg8: memref<8x128xbf16, #tpu.memory_space<vmem>>) attributes {dimension_semantics = [#tpu.dimension_semantics<parallel>], iteration_bounds = array<i64: 1>, scalar_prefetch = 0 : i64, scratch_operands = 0 : i64, tpu.core_type = #tpu.core_type<tc>, window_params = [{transform_indices = @transform_0, window_bounds = array<i64: 8, 784>}, {pipeline_mode = #tpu.pipeline_mode<synchronous>, transform_indices = @transform_1, window_bounds = array<i64: 784, 512>}, {pipeline_mode = #tpu.pipeline_mode<synchronous>, transform_indices = @transform_2, window_bounds = array<i64: 1, 512>}, {pipeline_mode = #tpu.pipeline_mode<synchronous>, transform_indices = @transform_3, window_bounds = array<i64: 512, 512>}, {pipeline_mode = #tpu.pipeline_mode<synchronous>, transform_indices = @transform_4, window_bounds = array<i64: 1, 512>}, {pipeline_mode = #tpu.pipeline_mode<synchronous>, transform_indices = @transform_5, window_bounds = array<i64: 512, 128>}, {pipeline_mode = #tpu.pipeline_mode<synchronous>, transform_indices = @transform_6, window_bounds = array<i64: 1, 128>}, {transform_indices = @transform_7, window_bounds = array<i64: 8, 128>}]} {
    %c0 = arith.constant 0 : index
    %c0_0 = arith.constant 0 : index
    %0 = vector.load %arg1[%c0, %c0_0] : memref<8x784xf32, #tpu.memory_space<vmem>>, vector<8x784xf32>
    %1 = arith.truncf %0 : vector<8x784xf32> to vector<8x784xbf16>
    %c0_1 = arith.constant 0 : index
    %c0_2 = arith.constant 0 : index
    %2 = vector.load %arg2[%c0_1, %c0_2] : memref<784x512xbf16, #tpu.memory_space<vmem>>, vector<784x512xbf16>
    %cst = arith.constant dense<0.000000e+00> : vector<8x512xf32>
    %3 = tpu.matmul %1, %2, %cst {dimension_numbers = #tpu.dot_dimension_numbers<[1], [0], [0], [1], [0, 0, 1, 1], [], []>} : vector<8x784xbf16>, vector<784x512xbf16>, vector<8x512xf32> -> vector<8x512xf32>
    %c0_3 = arith.constant 0 : index
    %c0_4 = arith.constant 0 : index
    %4 = vector.load %arg3[%c0_3, %c0_4] : memref<1x512xf32, #tpu.memory_space<vmem>>, vector<1x512xf32>
    %5 = vector.broadcast %4 : vector<1x512xf32> to vector<8x512xf32>
    %6 = arith.addf %3, %5 : vector<8x512xf32>
    %cst_5 = arith.constant 0.000000e+00 : f32
    %7 = vector.broadcast %cst_5 : f32 to vector<8x512xf32>
    %8 = arith.maximumf %6, %7 : vector<8x512xf32>
    %9 = arith.truncf %8 : vector<8x512xf32> to vector<8x512xbf16>
    %c0_6 = arith.constant 0 : index
    %c0_7 = arith.constant 0 : index
    %10 = vector.load %arg4[%c0_6, %c0_7] : memref<512x512xbf16, #tpu.memory_space<vmem>>, vector<512x512xbf16>
    %cst_8 = arith.constant dense<0.000000e+00> : vector<8x512xf32>
    %11 = tpu.matmul %9, %10, %cst_8 {dimension_numbers = #tpu.dot_dimension_numbers<[1], [0], [0], [1], [0, 0, 1, 1], [], []>} : vector<8x512xbf16>, vector<512x512xbf16>, vector<8x512xf32> -> vector<8x512xf32>
    %c0_9 = arith.constant 0 : index
    %c0_10 = arith.constant 0 : index
    %12 = vector.load %arg5[%c0_9, %c0_10] : memref<1x512xf32, #tpu.memory_space<vmem>>, vector<1x512xf32>
    %13 = vector.broadcast %12 : vector<1x512xf32> to vector<8x512xf32>
    %14 = arith.addf %11, %13 : vector<8x512xf32>
    %cst_11 = arith.constant 0.000000e+00 : f32
    %15 = vector.broadcast %cst_11 : f32 to vector<8x512xf32>
    %16 = arith.maximumf %14, %15 : vector<8x512xf32>
    %17 = arith.truncf %16 : vector<8x512xf32> to vector<8x512xbf16>
    %c0_12 = arith.constant 0 : index
    %c0_13 = arith.constant 0 : index
    %18 = vector.load %arg6[%c0_12, %c0_13] : memref<512x128xbf16, #tpu.memory_space<vmem>>, vector<512x128xbf16>
    %cst_14 = arith.constant dense<0.000000e+00> : vector<8x128xf32>
    %19 = tpu.matmul %17, %18, %cst_14 {dimension_numbers = #tpu.dot_dimension_numbers<[1], [0], [0], [1], [0, 0, 1, 1], [], []>} : vector<8x512xbf16>, vector<512x128xbf16>, vector<8x128xf32> -> vector<8x128xf32>
    %c0_15 = arith.constant 0 : index
    %c0_16 = arith.constant 0 : index
    %20 = vector.load %arg7[%c0_15, %c0_16] : memref<1x128xf32, #tpu.memory_space<vmem>>, vector<1x128xf32>
    %21 = vector.broadcast %20 : vector<1x128xf32> to vector<8x128xf32>
    %22 = arith.addf %19, %21 : vector<8x128xf32>
    %cst_17 = arith.constant 0.000000e+00 : f32
    %23 = vector.broadcast %cst_17 : f32 to vector<8x128xf32>
    %24 = arith.maximumf %22, %23 : vector<8x128xf32>
    %25 = arith.truncf %24 : vector<8x128xf32> to vector<8x128xbf16>
    %c0_18 = arith.constant 0 : index
    %c0_19 = arith.constant 0 : index
    %26 = vector.load %arg8[%c0_18, %c0_19] : memref<8x128xbf16, #tpu.memory_space<vmem>>, vector<8x128xbf16>
    tpu.vector_store %arg8[%c0_18, %c0_19], %25 {strides = array<i32>} : memref<8x128xbf16, #tpu.memory_space<vmem>>, vector<8x128xbf16>,
    return
  }
  func.func @transform_0(%arg0: i32) -> (i32, i32) {
    %c0_i32 = arith.constant 0 : i32
    %c0_i32_0 = arith.constant 0 : i32
    return %arg0, %c0_i32 : i32, i32
  }
  func.func @transform_1(%arg0: i32) -> (i32, i32) {
    %c0_i32 = arith.constant 0 : i32
    %c0_i32_0 = arith.constant 0 : i32
    %c0_i32_1 = arith.constant 0 : i32
    return %c0_i32, %c0_i32_0 : i32, i32
  }
  func.func @transform_2(%arg0: i32) -> (i32, i32) {
    %c0_i32 = arith.constant 0 : i32
    %c0_i32_0 = arith.constant 0 : i32
    %c0_i32_1 = arith.constant 0 : i32
    return %c0_i32, %c0_i32_0 : i32, i32
  }
  func.func @transform_3(%arg0: i32) -> (i32, i32) {
    %c0_i32 = arith.constant 0 : i32
    %c0_i32_0 = arith.constant 0 : i32
    %c0_i32_1 = arith.constant 0 : i32
    return %c0_i32, %c0_i32_0 : i32, i32
  }
  func.func @transform_4(%arg0: i32) -> (i32, i32) {
    %c0_i32 = arith.constant 0 : i32
    %c0_i32_0 = arith.constant 0 : i32
    %c0_i32_1 = arith.constant 0 : i32
    return %c0_i32, %c0_i32_0 : i32, i32
  }
  func.func @transform_5(%arg0: i32) -> (i32, i32) {
    %c0_i32 = arith.constant 0 : i32
    %c0_i32_0 = arith.constant 0 : i32
    %c0_i32_1 = arith.constant 0 : i32
    return %c0_i32, %c0_i32_0 : i32, i32
  }
  func.func @transform_6(%arg0: i32) -> (i32, i32) {
    %c0_i32 = arith.constant 0 : i32
    %c0_i32_0 = arith.constant 0 : i32
    %c0_i32_1 = arith.constant 0 : i32
    return %c0_i32, %c0_i32_0 : i32, i32
  }
  func.func @transform_7(%arg0: i32) -> (i32, i32) {
    %c0_i32 = arith.constant 0 : i32
    %c0_i32_0 = arith.constant 0 : i32
    return %arg0, %c0_i32 : i32, i32
  }
}

</mosaic_0001>

<bundles_post_ra>
// kernel: mlp_forward.1
= control target key start
LH: loop header
LB: loop body
LE: loop exit
PB: predicated region body
PF: predicated region fallthrough
CT: control target
= control target key end

     0   :  { %vm1239_vm0 = vcmask 130048   ;;  %s5026_s1 = inlined_call_operand.vmem [shape: bf16[784,512], index: 1, kind: input, shape index: {}]   ;;  %s5027_s0 = inlined_call_operand.vmem [shape: f32[8,784], index: 0, kind: input, shape index: {}]   ;;  %s5028_s3 = inlined_call_operand.vmem [shape: bf16[512,512], index: 3, kind: input, shape index: {}]   ;;  %s5029_s5 = inlined_call_operand.vmem [shape: bf16[512,128], index: 5, kind: input, shape index: {}]   ;;  %s5030_s2 = inlined_call_operand.vmem [shape: f32[1,512], index: 2, kind: input, shape index: {}]   ;;  %s5031_s4 = inlined_call_operand.vmem [shape: f32[1,512], index: 4, kind: input, shape index: {}]   ;;  %s5032_s6 = inlined_call_operand.vmem [shape: f32[1,128], index: 6, kind: input, shape index: {}]   ;;  %s5033_s7 = inlined_call_operand.vmem [shape: bf16[8,128], index: 7, kind: output, shape index: {}]  }
   0x1   :  { %v3335_v0 = vld [vmem:[%s5026_s1 + $0x4] ss:$16 sps:$4 sm:$0xff]   ;;  %v3337_v1 = vld [vmem:[%s5026_s1 + $0xc] ss:$16 sps:$4 sm:$0xff]   ;;  %v3339_v2 = vld [vmem:[%s5026_s1] ss:$16 sps:$4 sm:$0xff]  }
   0x2   :  { %1243 = vmatprep.subr.bf16.mxu0 %v3335_v0  ;;  %v3340_v3 = vld [vmem:[%s5026_s1 + $0x8] ss:$16 sps:$4 sm:$0xff]   ;;  %1407 = vmatprep.subr.bf16.mxu1 %v3337_v1  ;;  %v3341_v4 = vld [vmem:[%s5026_s1 + $0x24] ss:$16 sps:$4 sm:$0xff]   ;;  %v3343_v5 = vld [vmem:[%s5026_s1 + $0x2c] ss:$16 sps:$4 sm:$0xff]  }
   0x3   :  { %1244 = vmatpush1.bf16.msra.mxu0 %v3339_v2  ;;  %1408 = vmatpush1.bf16.msra.mxu1 %v3340_v3  ;;  %v3345_v6 = vld [vmem:[%s5026_s1 + $0x20] ss:$16 sps:$4 sm:$0xff]   ;;  %v3346_v7 = vld [vmem:[%s5026_s1 + $0x28] ss:$16 sps:$4 sm:$0xff]   ;;  %v3347_v8 = vld [vmem:[%s5026_s1 + $0x44] ss:$16 sps:$4 sm:$0xff]  }
   0x4   :  { %1245 = vmatprep.subr.bf16.mxu0 %v3341_v4  ;;  %1409 = vmatprep.subr.bf16.mxu1 %v3343_v5  ;;  %v3349_v9 = vld [vmem:[%s5026_s1 + $0x4c] ss:$16 sps:$4 sm:$0xff]   ;;  %v3351_v10 = vld [vmem:[%s5026_s1 + $0x40] ss:$16 sps:$4 sm:$0xff]   ;;  %v3352_v11 = vld [vmem:[%s5026_s1 + $0x48] ss:$16 sps:$4 sm:$0xff]  }
   0x5   :  { %v3353_v12 = vld [vmem:[%s5026_s1 + $0x64] ss:$16 sps:$4 sm:$0xff]   ;;  %v3355_v13 = vld [vmem:[%s5026_s1 + $0x6c] ss:$16 sps:$4 sm:$0xff]   ;;  %v3357_v14 = vld [vmem:[%s5026_s1 + $0x60] ss:$16 sps:$4 sm:$0xff]  }
   0x6   :  { %v3358_v15 = vld [vmem:[%s5026_s1 + $0x68] ss:$16 sps:$4 sm:$0xff]   ;;  %v3359_v16 = vld [vmem:[%s5026_s1 + $0x84] ss:$16 sps:$4 sm:$0xff]   ;;  %v3361_v17 = vld [vmem:[%s5026_s1 + $0x8c] ss:$16 sps:$4 sm:$0xff]  }
   0x7   :  { %1246 = vmatpush1.bf16.msra.mxu0 %v3345_v6  ;;  %1410 = vmatpush1.bf16.msra.mxu1 %v3346_v7  ;;  %v3363_v18 = vld [vmem:[%s5026_s1 + $0x80] ss:$16 sps:$4 sm:$0xff]   ;;  %v3364_v19 = vld [vmem:[%s5026_s1 + $0x88] ss:$16 sps:$4 sm:$0xff]   ;;  %v3365_v20 = vld [vmem:[%s5026_s1 + $0xa4] ss:$16 sps:$4 sm:$0xff]  }
   0x8   :  { %1247 = vmatprep.subr.bf16.mxu0 %v3347_v8  ;;  %1411 = vmatprep.subr.bf16.mxu1 %v3349_v9  ;;  %v3367_v21 = vld [vmem:[%s5026_s1 + $0xac] ss:$16 sps:$4 sm:$0xff]   ;;  %v3369_v22 = vld [vmem:[%s5026_s1 + $0xa0] ss:$16 sps:$4 sm:$0xff]   ;;  %v3370_v23 = vld [vmem:[%s5026_s1 + $0xa8] ss:$16 sps:$4 sm:$0xff]  }
   0x9   :  { %v3371_v24 = vld [vmem:[%s5026_s1 + $0xc4] ss:$16 sps:$4 sm:$0xff]   ;;  %v3373_v25 = vld [vmem:[%s5026_s1 + $0xcc] ss:$16 sps:$4 sm:$0xff]   ;;  %v3375_v26 = vld [vmem:[%s5026_s1 + $0xc0] ss:$16 sps:$4 sm:$0xff]  }
   0xa   :  { %v3376_v27 = vld [vmem:[%s5026_s1 + $0xc8] ss:$16 sps:$4 sm:$0xff]   ;;  %v3377_v28 = vld [vmem:[%s5026_s1 + $0xe4] ss:$16 sps:$4 sm:$0xff]   ;;  %v3379_v29 = vld [vmem:[%s5026_s1 + $0xec] ss:$16 sps:$4 sm:$0xff]  }
   0xb   :  { %1248 = vmatpush1.bf16.msra.mxu0 %v3351_v10  ;;  %1412 = vmatpush1.bf16.msra.mxu1 %v3352_v11  ;;  %v3381_v30 = vld [vmem:[%s5026_s1 + $0xe0] ss:$16 sps:$4 sm:$0xff]   ;;  %v3382_v31 = vld [vmem:[%s5026_s1 + $0xe8] ss:$16 sps:$4 sm:$0xff]   ;;  %v3383_v32 = vld [vmem:[%s5026_s1 + $0x104] ss:$16 sps:$4 sm:$0xff]  }
   0xc   :  { %1249 = vmatprep.subr.bf16.mxu0 %v3353_v12  ;;  %1413 = vmatprep.subr.bf16.mxu1 %v3355_v13  ;;  %v3385_v33 = vld [vmem:[%s5026_s1 + $0x10c] ss:$16 sps:$4 sm:$0xff]   ;;  %v3387_v34 = vld [vmem:[%s5026_s1 + $0x100] ss:$16 sps:$4 sm:$0xff]   ;;  %v3388_v35 = vld [vmem:[%s5026_s1 + $0x108] ss:$16 sps:$4 sm:$0xff]  }
   0xd   :  { %v3389_v36 = vld [vmem:[%s5026_s1 + $0x124] ss:$16 sps:$4 sm:$0xff]   ;;  %v3391_v37 = vld [vmem:[%s5026_s1 + $0x12c] ss:$16 sps:$4 sm:$0xff]   ;;  %v3393_v38 = vld [vmem:[%s5026_s1 + $0x120] ss:$16 sps:$4 sm:$0xff]  }
   0xe   :  { %v3394_v39 = vld [vmem:[%s5026_s1 + $0x128] ss:$16 sps:$4 sm:$0xff]   ;;  %v3395_v40 = vld [vmem:[%s5026_s1 + $0x144] ss:$16 sps:$4 sm:$0xff]   ;;  %v3397_v41 = vld [vmem:[%s5026_s1 + $0x14c] ss:$16 sps:$4 sm:$0xff]  }
   0xf   :  { %1250 = vmatpush1.bf16.msra.mxu0 %v3357_v14  ;;  %1414 = vmatpush1.bf16.msra.mxu1 %v3358_v15  ;;  %v3399_v42 = vld [vmem:[%s5026_s1 + $0x140] ss:$16 sps:$4 sm:$0xff]   ;;  %v3400_v43 = vld [vmem:[%s5026_s1 + $0x148] ss:$16 sps:$4 sm:$0xff]   ;;  %v3401_v44 = vld [vmem:[%s5026_s1 + $0x164] ss:$16 sps:$4 sm:$0xff]  }
  0x10   :  { %1251 = vmatprep.subr.bf16.mxu0 %v3359_v16  ;;  %1415 = vmatprep.subr.bf16.mxu1 %v3361_v17  ;;  %v3403_v45 = vld [vmem:[%s5026_s1 + $0x16c] ss:$16 sps:$4 sm:$0xff]   ;;  %v3405_v47 = vld [vmem:[%s5026_s1 + $0x160] ss:$16 sps:$4 sm:$0xff]   ;;  %v3406_v49 = vld [vmem:[%s5026_s1 + $0x168] ss:$16 sps:$4 sm:$0xff]  }
  0x11   :  { %v28_v46 = vld [vmem:[%s5027_s0 + $0x8] sm:$0xff]  ;;  %v3407_v50 = vld [vmem:[%s5026_s1 + $0x184] ss:$16 sps:$4 sm:$0xff]   ;;  %v3411_v52 = vld [vmem:[%s5026_s1 + $0x180] ss:$16 sps:$4 sm:$0xff]  }
  0x12   :  { %v35_v48 = vpack.c.bf16 %v28_v46, %v28_v46  ;;  %v3409_v51 = vld [vmem:[%s5026_s1 + $0x18c] ss:$16 sps:$4 sm:$0xff]   ;;  %v3412_v53 = vld [vmem:[%s5026_s1 + $0x188] ss:$16 sps:$4 sm:$0xff]   ;;  %v3413_v54 = vld [vmem:[%s5026_s1 + $0x1a4] ss:$16 sps:$4 sm:$0xff]  }
  0x13   :  { %1252 = vmatpush1.bf16.msra.mxu0 %v3363_v18  ;;  %1416 = vmatpush1.bf16.msra.mxu1 %v3364_v19  ;;  %v3415_v55 = vld [vmem:[%s5026_s1 + $0x1ac] ss:$16 sps:$4 sm:$0xff]   ;;  %v3417_v56 = vld [vmem:[%s5026_s1 + $0x1a0] ss:$16 sps:$4 sm:$0xff]   ;;  %v3418_v57 = vld [vmem:[%s5026_s1 + $0x1a8] ss:$16 sps:$4 sm:$0xff]  }
  0x14   :  { %1253 = vmatprep.subr.bf16.mxu0 %v3365_v20  ;;  %1417 = vmatprep.subr.bf16.mxu1 %v3367_v21  ;;  %v3419_v58 = vld [vmem:[%s5026_s1 + $0x1c4] ss:$16 sps:$4 sm:$0xff]   ;;  %v3421_v59 = vld [vmem:[%s5026_s1 + $0x1cc] ss:$16 sps:$4 sm:$0xff]   ;;  %v3423_v60 = vld [vmem:[%s5026_s1 + $0x1c0] ss:$16 sps:$4 sm:$0xff]  }
  0x15   :  { %1275 = vmatprep.mubr.bf16.mxu0 %v35_v48  ;;  %1439 = vmatprep.mubr.bf16.mxu1 %v35_v48  ;;  %v3424_v61 = vld [vmem:[%s5026_s1 + $0x1c8] ss:$16 sps:$4 sm:$0xff]   ;;  %v3425_v62 = vld [vmem:[%s5026_s1 + $0x1e4] ss:$16 sps:$4 sm:$0xff]   ;;  %v3427_v63 = vld [vmem:[%s5026_s1 + $0x1ec] ss:$16 sps:$4 sm:$0xff]  }
  0x16   :  { %v3429_v0 = vld [vmem:[%s5026_s1 + $0x1e0] ss:$16 sps:$4 sm:$0xff]   ;;  %v3430_v1 = vld [vmem:[%s5026_s1 + $0x1e8] ss:$16 sps:$4 sm:$0xff]   ;;  %v3433_v3 = vld [vmem:[%s5026_s1 + $0x204] ss:$16 sps:$4 sm:$0xff]  }
  0x17   :  { %1254 = vmatpush1.bf16.msra.mxu0 %v3369_v22  ;;  %1418 = vmatpush1.bf16.msra.mxu1 %v3370_v23  ;;  %v27_v2 = vld [vmem:[%s5027_s0] sm:$0xff]  ;;  %v3436_v4 = vld [vmem:[%s5026_s1 + $0x20c] ss:$16 sps:$4 sm:$0xff]   ;;  %v3434_v7 = vld [vmem:[%s5026_s1 + $0x208] ss:$16 sps:$4 sm:$0xff]  }
  0x18   :  { %1255 = vmatprep.subr.bf16.mxu0 %v3371_v24  ;;  %1419 = vmatprep.subr.bf16.mxu1 %v3373_v25  ;;  %v34_v5 = vpack.c.bf16 %v27_v2, %v27_v2  ;;  %v3431_v6 = vld [vmem:[%s5026_s1 + $0x200] ss:$16 sps:$4 sm:$0xff]   ;;  %v3439_v8 = vld [vmem:[%s5026_s1 + $0x224] ss:$16 sps:$4 sm:$0xff]   ;;  %v3442_v9 = vld [vmem:[%s5026_s1 + $0x22c] ss:$16 sps:$4 sm:$0xff]  }
  0x19   :  { %v3437_v10 = vld [vmem:[%s5026_s1 + $0x220] ss:$16 sps:$4 sm:$0xff]   ;;  %v3440_v11 = vld [vmem:[%s5026_s1 + $0x228] ss:$16 sps:$4 sm:$0xff]   ;;  %v3445_v12 = vld [vmem:[%s5026_s1 + $0x244] ss:$16 sps:$4 sm:$0xff]  }
  0x1a   :  { %v3448_v13 = vld [vmem:[%s5026_s1 + $0x24c] ss:$16 sps:$4 sm:$0xff]   ;;  %v3443_v14 = vld [vmem:[%s5026_s1 + $0x240] ss:$16 sps:$4 sm:$0xff]   ;;  %v3446_v15 = vld [vmem:[%s5026_s1 + $0x248] ss:$16 sps:$4 sm:$0xff]  }
  0x1b   :  { %1256 = vmatpush1.bf16.msra.mxu0 %v3375_v26  ;;  %1420 = vmatpush1.bf16.msra.mxu1 %v3376_v27  ;;  %v3451_v16 = vld [vmem:[%s5026_s1 + $0x264] ss:$16 sps:$4 sm:$0xff]   ;;  %v3454_v17 = vld [vmem:[%s5026_s1 + $0x26c] ss:$16 sps:$4 sm:$0xff]   ;;  %v3449_v18 = vld [vmem:[%s5026_s1 + $0x260] ss:$16 sps:$4 sm:$0xff]  }
  0x1c   :  { %1257 = vmatprep.subr.bf16.mxu0 %v3377_v28  ;;  %1421 = vmatprep.subr.bf16.mxu1 %v3379_v29  ;;  %v3452_v19 = vld [vmem:[%s5026_s1 + $0x268] ss:$16 sps:$4 sm:$0xff]   ;;  %v3457_v20 = vld [vmem:[%s5026_s1 + $0x284] ss:$16 sps:$4 sm:$0xff]   ;;  %v3460_v21 = vld [vmem:[%s5026_s1 + $0x28c] ss:$16 sps:$4 sm:$0xff]  }
  0x1d   :  { %v3455_v22 = vld [vmem:[%s5026_s1 + $0x280] ss:$16 sps:$4 sm:$0xff]   ;;  %v3458_v23 = vld [vmem:[%s5026_s1 + $0x288] ss:$16 sps:$4 sm:$0xff]   ;;  %v3463_v24 = vld [vmem:[%s5026_s1 + $0x2a4] ss:$16 sps:$4 sm:$0xff]  }
  0x1e   :  { %v3466_v25 = vld [vmem:[%s5026_s1 + $0x2ac] ss:$16 sps:$4 sm:$0xff]   ;;  %v3461_v26 = vld [vmem:[%s5026_s1 + $0x2a0] ss:$16 sps:$4 sm:$0xff]   ;;  %v3464_v27 = vld [vmem:[%s5026_s1 + $0x2a8] ss:$16 sps:$4 sm:$0xff]  }
  0x1f   :  { %1258 = vmatpush1.bf16.msra.mxu0 %v3381_v30  ;;  %1422 = vmatpush1.bf16.msra.mxu1 %v3382_v31  ;;  %v3469_v28 = vld [vmem:[%s5026_s1 + $0x2c4] ss:$16 sps:$4 sm:$0xff]   ;;  %v3472_v29 = vld [vmem:[%s5026_s1 + $0x2cc] ss:$16 sps:$4 sm:$0xff]   ;;  %v3467_v31 = vld [vmem:[%s5026_s1 + $0x2c0] ss:$16 sps:$4 sm:$0xff]  }
  0x20   :  { %1259 = vmatprep.subr.bf16.mxu0 %v3383_v32  ;;  %1423 = vmatprep.subr.bf16.mxu1 %v3385_v33  ;;  %v30_v30 = vld [vmem:[%s5027_s0 + $0x18] sm:$0xff]  ;;  %v3493_v46 = vld [vmem:[%s5026_s1 + $0x344] ss:$16 sps:$4 sm:$0xff]   ;;  %v3491_v48 = vld [vmem:[%s5026_s1 + $0x340] ss:$16 sps:$4 sm:$0xff]  }
  0x21   :  { %v37_v32 = vpack.c.bf16 %v30_v30, %v30_v30  ;;  %v3470_v33 = vld [vmem:[%s5026_s1 + $0x2c8] ss:$16 sps:$4 sm:$0xff]   ;;  %v3523_v2 = vld [vmem:[%s5026_s1 + $0x3e4] ss:$16 sps:$4 sm:$0xff]  }
  0x22   :  { %v3559_v30 = vld [vmem:[%s5026_s1 + $0x4a4] ss:$16 sps:$4 sm:$0xff]  }
  0x23   :  { %1260 = vmatpush1.bf16.msra.mxu0 %v3387_v34  ;;  %1424 = vmatpush1.bf16.msra.mxu1 %v3388_v35  ;;  %v3475_v34 = vld [vmem:[%s5026_s1 + $0x2e4] ss:$16 sps:$4 sm:$0xff]   ;;  %v3478_v35 = vld [vmem:[%s5026_s1 + $0x2ec] ss:$16 sps:$4 sm:$0xff]  }
  0x24   :  { %1261 = vmatprep.subr.bf16.mxu0 %v3389_v36  ;;  %1425 = vmatprep.subr.bf16.mxu1 %v3391_v37  ;;  %v3473_v36 = vld [vmem:[%s5026_s1 + $0x2e0] ss:$16 sps:$4 sm:$0xff]   ;;  %v3476_v37 = vld [vmem:[%s5026_s1 + $0x2e8] ss:$16 sps:$4 sm:$0xff]  }
  0x27   :  { %1262 = vmatpush1.bf16.msra.mxu0 %v3393_v38  ;;  %1426 = vmatpush1.bf16.msra.mxu1 %v3394_v39  ;;  %v3481_v38 = vld [vmem:[%s5026_s1 + $0x304] ss:$16 sps:$4 sm:$0xff]   ;;  %v3484_v39 = vld [vmem:[%s5026_s1 + $0x30c] ss:$16 sps:$4 sm:$0xff]  }
  0x28   :  { %1263 = vmatprep.subr.bf16.mxu0 %v3395_v40  ;;  %1427 = vmatprep.subr.bf16.mxu1 %v3397_v41  ;;  %v3479_v40 = vld [vmem:[%s5026_s1 + $0x300] ss:$16 sps:$4 sm:$0xff]   ;;  %v3482_v41 = vld [vmem:[%s5026_s1 + $0x308] ss:$16 sps:$4 sm:$0xff]  }
  0x2b   :  { %1264 = vmatpush1.bf16.msra.mxu0 %v3399_v42  ;;  %1428 = vmatpush1.bf16.msra.mxu1 %v3400_v43  ;;  %v3487_v42 = vld [vmem:[%s5026_s1 + $0x324] ss:$16 sps:$4 sm:$0xff]   ;;  %v3490_v43 = vld [vmem:[%s5026_s1 + $0x32c] ss:$16 sps:$4 sm:$0xff]  }
  0x2c   :  { %1265 = vmatprep.subr.bf16.mxu0 %v3401_v44  ;;  %1429 = vmatprep.subr.bf16.mxu1 %v3403_v45  ;;  %v3485_v44 = vld [vmem:[%s5026_s1 + $0x320] ss:$16 sps:$4 sm:$0xff]   ;;  %v3488_v45 = vld [vmem:[%s5026_s1 + $0x328] ss:$16 sps:$4 sm:$0xff]  }
  0x2f   :  { %1266 = vmatpush1.bf16.msra.mxu0 %v3405_v47  ;;  %1430 = vmatpush1.bf16.msra.mxu1 %v3406_v49  ;;  %v3496_v47 = vld [vmem:[%s5026_s1 + $0x34c] ss:$16 sps:$4 sm:$0xff]   ;;  %v3494_v49 = vld [vmem:[%s5026_s1 + $0x348] ss:$16 sps:$4 sm:$0xff]  }
  0x30   :  { %1267 = vmatprep.subr.bf16.mxu0 %v3407_v50  ;;  %1431 = vmatprep.subr.bf16.mxu1 %v3409_v51  ;;  %v3499_v50 = vld [vmem:[%s5026_s1 + $0x364] ss:$16 sps:$4 sm:$0xff]   ;;  %v3502_v51 = vld [vmem:[%s5026_s1 + $0x36c] ss:$16 sps:$4 sm:$0xff]  }
  0x33   :  { %1268 = vmatpush1.bf16.msra.mxu0 %v3411_v52  ;;  %1432 = vmatpush1.bf16.msra.mxu1 %v3412_v53  ;;  %v3497_v52 = vld [vmem:[%s5026_s1 + $0x360] ss:$16 sps:$4 sm:$0xff]   ;;  %v3500_v53 = vld [vmem:[%s5026_s1 + $0x368] ss:$16 sps:$4 sm:$0xff]  }
  0x34   :  { %1269 = vmatprep.subr.bf16.mxu0 %v3413_v54  ;;  %1433 = vmatprep.subr.bf16.mxu1 %v3415_v55  ;;  %v3505_v54 = vld [vmem:[%s5026_s1 + $0x384] ss:$16 sps:$4 sm:$0xff]   ;;  %v3508_v55 = vld [vmem:[%s5026_s1 + $0x38c] ss:$16 sps:$4 sm:$0xff]  }
  0x37   :  { %1270 = vmatpush1.bf16.msra.mxu0 %v3417_v56  ;;  %1434 = vmatpush1.bf16.msra.mxu1 %v3418_v57  ;;  %v3503_v56 = vld [vmem:[%s5026_s1 + $0x380] ss:$16 sps:$4 sm:$0xff]   ;;  %v3506_v57 = vld [vmem:[%s5026_s1 + $0x388] ss:$16 sps:$4 sm:$0xff]  }
  0x38   :  { %1271 = vmatprep.subr.bf16.mxu0 %v3419_v58  ;;  %1435 = vmatprep.subr.bf16.mxu1 %v3421_v59  ;;  %v3511_v58 = vld [vmem:[%s5026_s1 + $0x3a4] ss:$16 sps:$4 sm:$0xff]   ;;  %v3514_v59 = vld [vmem:[%s5026_s1 + $0x3ac] ss:$16 sps:$4 sm:$0xff]  }
  0x3b   :  { %1272 = vmatpush1.bf16.msra.mxu0 %v3423_v60  ;;  %1436 = vmatpush1.bf16.msra.mxu1 %v3424_v61  ;;  %v3509_v60 = vld [vmem:[%s5026_s1 + $0x3a0] ss:$16 sps:$4 sm:$0xff]   ;;  %v3512_v61 = vld [vmem:[%s5026_s1 + $0x3a8] ss:$16 sps:$4 sm:$0xff]  }
  0x3c   :  { %1273 = vmatprep.subr.bf16.mxu0 %v3425_v62  ;;  %1437 = vmatprep.subr.bf16.mxu1 %v3427_v63  ;;  %v3517_v62 = vld [vmem:[%s5026_s1 + $0x3c4] ss:$16 sps:$4 sm:$0xff]   ;;  %v3520_v63 = vld [vmem:[%s5026_s1 + $0x3cc] ss:$16 sps:$4 sm:$0xff]  }
  0x3f   :  { %1274 = vmatpush1.bf16.msra.mxu0 %v3429_v0  ;;  %1438 = vmatpush1.bf16.msra.mxu1 %v3430_v1  ;;  %v3515_v0 = vld [vmem:[%s5026_s1 + $0x3c0] ss:$16 sps:$4 sm:$0xff]   ;;  %v3518_v1 = vld [vmem:[%s5026_s1 + $0x3c8] ss:$16 sps:$4 sm:$0xff]  }
  0x40   :  { %1284 = vmatprep.subr.bf16.mxu0 %v3433_v3  ;;  %1448 = vmatprep.subr.bf16.mxu1 %v3436_v4  ;;  %v3526_v3 = vld [vmem:[%s5026_s1 + $0x3ec] ss:$16 sps:$4 sm:$0xff]   ;;  %v3521_v4 = vld [vmem:[%s5026_s1 + $0x3e0] ss:$16 sps:$4 sm:$0xff]  }
  0x42   :  { %1276 = vmatmul.mubr.bf16.vlgmr.msra.gmra.mrb[0].mxu0 %v34_v5  ;;  %1440 = vmatmul.mubr.bf16.vlgmr.msra.gmra.mrb[0].mxu1 %v34_v5  ;;  %v3524_v5 = vld [vmem:[%s5026_s1 + $0x3e8] ss:$16 sps:$4 sm:$0xff]  }
  0x43   :  { %1285 = vmatpush1.bf16.msra.mxu0 %v3431_v6  ;;  %1449 = vmatpush1.bf16.msra.mxu1 %v3434_v7  ;;  %v3529_v6 = vld [vmem:[%s5026_s1 + $0x404] ss:$16 sps:$4 sm:$0xff]  }
  0x44   :  { %1286 = vmatprep.subr.bf16.mxu0 %v3439_v8  ;;  %1450 = vmatprep.subr.bf16.mxu1 %v3442_v9  ;;  %v29_v7 = vld [vmem:[%s5027_s0 + $0x10] sm:$0xff]  ;;  %v3532_v8 = vld [vmem:[%s5026_s1 + $0x40c] ss:$16 sps:$4 sm:$0xff]  }
  0x45   :  { %1316 = vmatprep.mubr.bf16.mxu0 %v37_v32  ;;  %1480 = vmatprep.mubr.bf16.mxu1 %v37_v32  ;;  %v3527_v9 = vld [vmem:[%s5026_s1 + $0x400] ss:$16 sps:$4 sm:$0xff]  }
  0x46   :  { %v3557_v32 = vld [vmem:[%s5026_s1 + $0x4a0] ss:$16 sps:$4 sm:$0xff]  }
  0x47   :  { %1287 = vmatpush1.bf16.msra.mxu0 %v3437_v10  ;;  %1451 = vmatpush1.bf16.msra.mxu1 %v3440_v11  ;;  %v36_v10 = vpack.c.bf16 %v29_v7, %v29_v7  ;;  %v3530_v11 = vld [vmem:[%s5026_s1 + $0x408] ss:$16 sps:$4 sm:$0xff]   ;;  %v3622_v7 = vld [vmem:[%s5026_s1 + $0x5ec] ss:$16 sps:$4 sm:$0xff]  }
  0x48   :  { %1288 = vmatprep.subr.bf16.mxu0 %v3445_v12  ;;  %1452 = vmatprep.subr.bf16.mxu1 %v3448_v13  ;;  %v3535_v12 = vld [vmem:[%s5026_s1 + $0x424] ss:$16 sps:$4 sm:$0xff]   ;;  %v3538_v13 = vld [vmem:[%s5026_s1 + $0x42c] ss:$16 sps:$4 sm:$0xff]  }
  0x4b   :  { %1289 = vmatpush1.bf16.msra.mxu0 %v3443_v14  ;;  %1453 = vmatpush1.bf16.msra.mxu1 %v3446_v15  ;;  %v32_v14 = vld [vmem:[%s5027_s0 + $0x28] sm:$0xff] }
  0x4c   :  { %1290 = vmatprep.subr.bf16.mxu0 %v3451_v16  ;;  %1454 = vmatprep.subr.bf16.mxu1 %v3454_v17  ;;  %v39_v15 = vpack.c.bf16 %v32_v14, %v32_v14  ;;  %v3533_v16 = vld [vmem:[%s5026_s1 + $0x420] ss:$16 sps:$4 sm:$0xff]   ;;  %v3536_v17 = vld [vmem:[%s5026_s1 + $0x428] ss:$16 sps:$4 sm:$0xff]  }
  0x4d   :  { %v3626_v14 = vld [vmem:[%s5026_s1 + $0x608] ss:$16 sps:$4 sm:$0xff]  }
  0x4f   :  { %1291 = vmatpush1.bf16.msra.mxu0 %v3449_v18  ;;  %1455 = vmatpush1.bf16.msra.mxu1 %v3452_v19  ;;  %v3541_v18 = vld [vmem:[%s5026_s1 + $0x444] ss:$16 sps:$4 sm:$0xff]   ;;  %v3544_v19 = vld [vmem:[%s5026_s1 + $0x44c] ss:$16 sps:$4 sm:$0xff]  }
  0x50   :  { %1292 = vmatprep.subr.bf16.mxu0 %v3457_v20  ;;  %1456 = vmatprep.subr.bf16.mxu1 %v3460_v21  ;;  %v3539_v20 = vld [vmem:[%s5026_s1 + $0x440] ss:$16 sps:$4 sm:$0xff]   ;;  %v3542_v21 = vld [vmem:[%s5026_s1 + $0x448] ss:$16 sps:$4 sm:$0xff]  }
  0x53   :  { %1293 = vmatpush1.bf16.msra.mxu0 %v3455_v22  ;;  %1457 = vmatpush1.bf16.msra.mxu1 %v3458_v23  ;;  %v3547_v22 = vld [vmem:[%s5026_s1 + $0x464] ss:$16 sps:$4 sm:$0xff]   ;;  %v3550_v23 = vld [vmem:[%s5026_s1 + $0x46c] ss:$16 sps:$4 sm:$0xff]  }
  0x54   :  { %1294 = vmatprep.subr.bf16.mxu0 %v3463_v24  ;;  %1458 = vmatprep.subr.bf16.mxu1 %v3466_v25  ;;  %v3545_v24 = vld [vmem:[%s5026_s1 + $0x460] ss:$16 sps:$4 sm:$0xff]   ;;  %v3548_v25 = vld [vmem:[%s5026_s1 + $0x468] ss:$16 sps:$4 sm:$0xff]  }
  0x57   :  { %1295 = vmatpush1.bf16.msra.mxu0 %v3461_v26  ;;  %1459 = vmatpush1.bf16.msra.mxu1 %v3464_v27  ;;  %v3553_v26 = vld [vmem:[%s5026_s1 + $0x484] ss:$16 sps:$4 sm:$0xff]   ;;  %v3556_v27 = vld [vmem:[%s5026_s1 + $0x48c] ss:$16 sps:$4 sm:$0xff]  }
  0x58   :  { %1296 = vmatprep.subr.bf16.mxu0 %v3469_v28  ;;  %1460 = vmatprep.subr.bf16.mxu1 %v3472_v29  ;;  %v3551_v28 = vld [vmem:[%s5026_s1 + $0x480] ss:$16 sps:$4 sm:$0xff]   ;;  %v3554_v29 = vld [vmem:[%s5026_s1 + $0x488] ss:$16 sps:$4 sm:$0xff]  }
  0x5b   :  { %1297 = vmatpush1.bf16.msra.mxu0 %v3467_v31  ;;  %1461 = vmatpush1.bf16.msra.mxu1 %v3470_v33  ;;  %v3562_v31 = vld [vmem:[%s5026_s1 + $0x4ac] ss:$16 sps:$4 sm:$0xff]   ;;  %v3560_v33 = vld [vmem:[%s5026_s1 + $0x4a8] ss:$16 sps:$4 sm:$0xff]  }
  0x5c   :  { %1298 = vmatprep.subr.bf16.mxu0 %v3475_v34  ;;  %1462 = vmatprep.subr.bf16.mxu1 %v3478_v35  ;;  %v3565_v34 = vld [vmem:[%s5026_s1 + $0x4c4] ss:$16 sps:$4 sm:$0xff]   ;;  %v3568_v35 = vld [vmem:[%s5026_s1 + $0x4cc] ss:$16 sps:$4 sm:$0xff]  }
  0x5f   :  { %1299 = vmatpush1.bf16.msra.mxu0 %v3473_v36  ;;  %1463 = vmatpush1.bf16.msra.mxu1 %v3476_v37  ;;  %v3563_v36 = vld [vmem:[%s5026_s1 + $0x4c0] ss:$16 sps:$4 sm:$0xff]   ;;  %v3566_v37 = vld [vmem:[%s5026_s1 + $0x4c8] ss:$16 sps:$4 sm:$0xff]  }
  0x60   :  { %1300 = vmatprep.subr.bf16.mxu0 %v3481_v38  ;;  %1464 = vmatprep.subr.bf16.mxu1 %v3484_v39  ;;  %v3571_v38 = vld [vmem:[%s5026_s1 + $0x4e4] ss:$16 sps:$4 sm:$0xff]   ;;  %v3574_v39 = vld [vmem:[%s5026_s1 + $0x4ec] ss:$16 sps:$4 sm:$0xff]  }
  0x63   :  { %1301 = vmatpush1.bf16.msra.mxu0 %v3479_v40  ;;  %1465 = vmatpush1.bf16.msra.mxu1 %v3482_v41  ;;  %v3569_v40 = vld [vmem:[%s5026_s1 + $0x4e0] ss:$16 sps:$4 sm:$0xff]   ;;  %v3572_v41 = vld [vmem:[%s5026_s1 + $0x4e8] ss:$16 sps:$4 sm:$0xff]  }
  0x64   :  { %1302 = vmatprep.subr.bf16.mxu0 %v3487_v42  ;;  %1466 = vmatprep.subr.bf16.mxu1 %v3490_v43  ;;  %v3577_v42 = vld [vmem:[%s5026_s1 + $0x504] ss:$16 sps:$4 sm:$0xff]   ;;  %v3580_v43 = vld [vmem:[%s5026_s1 + $0x50c] ss:$16 sps:$4 sm:$0xff]  }
  0x67   :  { %1303 = vmatpush1.bf16.msra.mxu0 %v3485_v44  ;;  %1467 = vmatpush1.bf16.msra.mxu1 %v3488_v45  ;;  %v3575_v44 = vld [vmem:[%s5026_s1 + $0x500] ss:$16 sps:$4 sm:$0xff]   ;;  %v3578_v45 = vld [vmem:[%s5026_s1 + $0x508] ss:$16 sps:$4 sm:$0xff]  }
  0x68   :  { %1304 = vmatprep.subr.bf16.mxu0 %v3493_v46  ;;  %1468 = vmatprep.subr.bf16.mxu1 %v3496_v47  ;;  %v3583_v46 = vld [vmem:[%s5026_s1 + $0x524] ss:$16 sps:$4 sm:$0xff]   ;;  %v3586_v47 = vld [vmem:[%s5026_s1 + $0x52c] ss:$16 sps:$4 sm:$0xff]  }
  0x6b   :  { %1305 = vmatpush1.bf16.msra.mxu0 %v3491_v48  ;;  %1469 = vmatpush1.bf16.msra.mxu1 %v3494_v49  ;;  %v3581_v48 = vld [vmem:[%s5026_s1 + $0x520] ss:$16 sps:$4 sm:$0xff]   ;;  %v3584_v49 = vld [vmem:[%s5026_s1 + $0x528] ss:$16 sps:$4 sm:$0xff]  }
  0x6c   :  { %1306 = vmatprep.subr.bf16.mxu0 %v3499_v50  ;;  %1470 = vmatprep.subr.bf16.mxu1 %v3502_v51  ;;  %v3589_v50 = vld [vmem:[%s5026_s1 + $0x544] ss:$16 sps:$4 sm:$0xff]   ;;  %v3592_v51 = vld [vmem:[%s5026_s1 + $0x54c] ss:$16 sps:$4 sm:$0xff]  }
  0x6f   :  { %1307 = vmatpush1.bf16.msra.mxu0 %v3497_v52  ;;  %1471 = vmatpush1.bf16.msra.mxu1 %v3500_v53  ;;  %v3587_v52 = vld [vmem:[%s5026_s1 + $0x540] ss:$16 sps:$4 sm:$0xff]   ;;  %v3590_v53 = vld [vmem:[%s5026_s1 + $0x548] ss:$16 sps:$4 sm:$0xff]  }
  0x70   :  { %1308 = vmatprep.subr.bf16.mxu0 %v3505_v54  ;;  %1472 = vmatprep.subr.bf16.mxu1 %v3508_v55  ;;  %v3595_v54 = vld [vmem:[%s5026_s1 + $0x564] ss:$16 sps:$4 sm:$0xff]   ;;  %v3598_v55 = vld [vmem:[%s5026_s1 + $0x56c] ss:$16 sps:$4 sm:$0xff]  }
  0x73   :  { %1309 = vmatpush1.bf16.msra.mxu0 %v3503_v56  ;;  %1473 = vmatpush1.bf16.msra.mxu1 %v3506_v57  ;;  %v3593_v56 = vld [vmem:[%s5026_s1 + $0x560] ss:$16 sps:$4 sm:$0xff]   ;;  %v3596_v57 = vld [vmem:[%s5026_s1 + $0x568] ss:$16 sps:$4 sm:$0xff]  }
  0x74   :  { %1310 = vmatprep.subr.bf16.mxu0 %v3511_v58  ;;  %1474 = vmatprep.subr.bf16.mxu1 %v3514_v59  ;;  %v3601_v58 = vld [vmem:[%s5026_s1 + $0x584] ss:$16 sps:$4 sm:$0xff]   ;;  %v3604_v59 = vld [vmem:[%s5026_s1 + $0x58c] ss:$16 sps:$4 sm:$0xff]  }
  0x77   :  { %1311 = vmatpush1.bf16.msra.mxu0 %v3509_v60  ;;  %1475 = vmatpush1.bf16.msra.mxu1 %v3512_v61  ;;  %v3599_v60 = vld [vmem:[%s5026_s1 + $0x580] ss:$16 sps:$4 sm:$0xff]   ;;  %v3602_v61 = vld [vmem:[%s5026_s1 + $0x588] ss:$16 sps:$4 sm:$0xff]  }
  0x78   :  { %1312 = vmatprep.subr.bf16.mxu0 %v3517_v62  ;;  %1476 = vmatprep.subr.bf16.mxu1 %v3520_v63  ;;  %v3607_v62 = vld [vmem:[%s5026_s1 + $0x5a4] ss:$16 sps:$4 sm:$0xff]   ;;  %v3610_v63 = vld [vmem:[%s5026_s1 + $0x5ac] ss:$16 sps:$4 sm:$0xff]  }
  0x7b   :  { %1313 = vmatpush1.bf16.msra.mxu0 %v3515_v0  ;;  %1477 = vmatpush1.bf16.msra.mxu1 %v3518_v1  ;;  %v3605_v0 = vld [vmem:[%s5026_s1 + $0x5a0] ss:$16 sps:$4 sm:$0xff]   ;;  %v3608_v1 = vld [vmem:[%s5026_s1 + $0x5a8] ss:$16 sps:$4 sm:$0xff]  }
  0x7c   :  { %1314 = vmatprep.subr.bf16.mxu0 %v3523_v2  ;;  %1478 = vmatprep.subr.bf16.mxu1 %v3526_v3  ;;  %v3613_v2 = vld [vmem:[%s5026_s1 + $0x5c4] ss:$16 sps:$4 sm:$0xff]   ;;  %v3616_v3 = vld [vmem:[%s5026_s1 + $0x5cc] ss:$16 sps:$4 sm:$0xff]  }
  0x7f   :  { %1315 = vmatpush1.bf16.msra.mxu0 %v3521_v4  ;;  %1479 = vmatpush1.bf16.msra.mxu1 %v3524_v5  ;;  %v3611_v4 = vld [vmem:[%s5026_s1 + $0x5c0] ss:$16 sps:$4 sm:$0xff]   ;;  %v3614_v5 = vld [vmem:[%s5026_s1 + $0x5c8] ss:$16 sps:$4 sm:$0xff]  }
  0x80   :  { %1325 = vmatprep.subr.bf16.mxu0 %v3529_v6  ;;  %1489 = vmatprep.subr.bf16.mxu1 %v3532_v8  ;;  %v3619_v6 = vld [vmem:[%s5026_s1 + $0x5e4] ss:$16 sps:$4 sm:$0xff]   ;;  %v3617_v8 = vld [vmem:[%s5026_s1 + $0x5e0] ss:$16 sps:$4 sm:$0xff]  }
  0x82   :  { %1317 = vmatmul.mubr.bf16.vlgmr.msra.gmra.mrb[0].mxu0 %v36_v10  ;;  %1481 = vmatmul.mubr.bf16.vlgmr.msra.gmra.mrb[0].mxu1 %v36_v10  ;;  %v31_v10 = vld [vmem:[%s5027_s0 + $0x20] sm:$0xff] }
  0x83   :  { %1326 = vmatpush1.bf16.msra.mxu0 %v3527_v9  ;;  %1490 = vmatpush1.bf16.msra.mxu1 %v3530_v11  ;;  %v3620_v9 = vld [vmem:[%s5026_s1 + $0x5e8] ss:$16 sps:$4 sm:$0xff]   ;;  %v3625_v11 = vld [vmem:[%s5026_s1 + $0x604] ss:$16 sps:$4 sm:$0xff]  }
  0x84   :  { %1327 = vmatprep.subr.bf16.mxu0 %v3535_v12  ;;  %1491 = vmatprep.subr.bf16.mxu1 %v3538_v13  ;;  %v3628_v12 = vld [vmem:[%s5026_s1 + $0x60c] ss:$16 sps:$4 sm:$0xff]   ;;  %v3623_v13 = vld [vmem:[%s5026_s1 + $0x600] ss:$16 sps:$4 sm:$0xff]  }
  0x85   :  { %1357 = vmatprep.mubr.bf16.mxu0 %v39_v15  ;;  %1521 = vmatprep.mubr.bf16.mxu1 %v39_v15  ;;  %v38_v15 = vpack.c.bf16 %v31_v10, %v31_v10  ;;  %v3710_v10 = vld [vmem:[%s5028_s3 + $0x1a8] ss:$16 sps:$4 sm:$0xff]  }
  0x87   :  { %1328 = vmatpush1.bf16.msra.mxu0 %v3533_v16  ;;  %1492 = vmatpush1.bf16.msra.mxu1 %v3536_v17  ;;  %v3631_v16 = vld [vmem:[%s5028_s3 + $0x4] ss:$16 sps:$4 sm:$0xff]   ;;  %v3634_v17 = vld [vmem:[%s5028_s3 + $0xc] ss:$16 sps:$4 sm:$0xff]  }
  0x88   :  { %1329 = vmatprep.subr.bf16.mxu0 %v3541_v18  ;;  %1493 = vmatprep.subr.bf16.mxu1 %v3544_v19  ;;  %v3853_v18 = vmov 0   ;;  %v33_v19 = vld [vmem:[%s5027_s0 + $0x30] sm:$0xff] }
  0x8b   :  { %1330 = vmatpush1.bf16.msra.mxu0 %v3539_v20  ;;  %1494 = vmatpush1.bf16.msra.mxu1 %v3542_v21  ;;  %v40_v20 = vpack.c.bf16 %v33_v19, %v33_v19  ;;  %v3629_v21 = vld [vmem:[%s5028_s3] ss:$16 sps:$4 sm:$0xff]   ;;  %v3727_v19 = vld [vmem:[%s5028_s3 + $0x204] ss:$16 sps:$4 sm:$0xff]  }
  0x8c   :  { %1331 = vmatprep.subr.bf16.mxu0 %v3547_v22  ;;  %1495 = vmatprep.subr.bf16.mxu1 %v3550_v23  ;;  %v3632_v22 = vld [vmem:[%s5028_s3 + $0x8] ss:$16 sps:$4 sm:$0xff]   ;;  %v3637_v23 = vld [vmem:[%s5028_s3 + $0x24] ss:$16 sps:$4 sm:$0xff]  }
  0x8f   :  { %1332 = vmatpush1.bf16.msra.mxu0 %v3545_v24  ;;  %1496 = vmatpush1.bf16.msra.mxu1 %v3548_v25  ;;  %v3640_v24 = vld [vmem:[%s5028_s3 + $0x2c] ss:$16 sps:$4 sm:$0xff]   ;;  %v3635_v25 = vld [vmem:[%s5028_s3 + $0x20] ss:$16 sps:$4 sm:$0xff]  }
  0x90   :  { %1333 = vmatprep.subr.bf16.mxu0 %v3553_v26  ;;  %1497 = vmatprep.subr.bf16.mxu1 %v3556_v27  ;;  %v3638_v26 = vld [vmem:[%s5028_s3 + $0x28] ss:$16 sps:$4 sm:$0xff]   ;;  %v3643_v27 = vld [vmem:[%s5028_s3 + $0x44] ss:$16 sps:$4 sm:$0xff]  }
  0x93   :  { %1334 = vmatpush1.bf16.msra.mxu0 %v3551_v28  ;;  %1498 = vmatpush1.bf16.msra.mxu1 %v3554_v29  ;;  %v3646_v28 = vld [vmem:[%s5028_s3 + $0x4c] ss:$16 sps:$4 sm:$0xff]   ;;  %v3641_v29 = vld [vmem:[%s5028_s3 + $0x40] ss:$16 sps:$4 sm:$0xff]  }
  0x94   :  { %1335 = vmatprep.subr.bf16.mxu0 %v3559_v30  ;;  %1499 = vmatprep.subr.bf16.mxu1 %v3562_v31  ;;  %v3644_v30 = vld [vmem:[%s5028_s3 + $0x48] ss:$16 sps:$4 sm:$0xff]   ;;  %v3649_v31 = vld [vmem:[%s5028_s3 + $0x64] ss:$16 sps:$4 sm:$0xff]  }
  0x97   :  { %1336 = vmatpush1.bf16.msra.mxu0 %v3557_v32  ;;  %1500 = vmatpush1.bf16.msra.mxu1 %v3560_v33  ;;  %v3652_v32 = vld [vmem:[%s5028_s3 + $0x6c] ss:$16 sps:$4 sm:$0xff]   ;;  %v3647_v33 = vld [vmem:[%s5028_s3 + $0x60] ss:$16 sps:$4 sm:$0xff]  }
  0x98   :  { %1337 = vmatprep.subr.bf16.mxu0 %v3565_v34  ;;  %1501 = vmatprep.subr.bf16.mxu1 %v3568_v35  ;;  %v3650_v34 = vld [vmem:[%s5028_s3 + $0x68] ss:$16 sps:$4 sm:$0xff]   ;;  %v3655_v35 = vld [vmem:[%s5028_s3 + $0x84] ss:$16 sps:$4 sm:$0xff]  }
  0x9b   :  { %1338 = vmatpush1.bf16.msra.mxu0 %v3563_v36  ;;  %1502 = vmatpush1.bf16.msra.mxu1 %v3566_v37  ;;  %v3658_v36 = vld [vmem:[%s5028_s3 + $0x8c] ss:$16 sps:$4 sm:$0xff]   ;;  %v3653_v37 = vld [vmem:[%s5028_s3 + $0x80] ss:$16 sps:$4 sm:$0xff]  }
  0x9c   :  { %1339 = vmatprep.subr.bf16.mxu0 %v3571_v38  ;;  %1503 = vmatprep.subr.bf16.mxu1 %v3574_v39  ;;  %v3656_v38 = vld [vmem:[%s5028_s3 + $0x88] ss:$16 sps:$4 sm:$0xff]   ;;  %v3661_v39 = vld [vmem:[%s5028_s3 + $0xa4] ss:$16 sps:$4 sm:$0xff]  }
  0x9f   :  { %1340 = vmatpush1.bf16.msra.mxu0 %v3569_v40  ;;  %1504 = vmatpush1.bf16.msra.mxu1 %v3572_v41  ;;  %v3664_v40 = vld [vmem:[%s5028_s3 + $0xac] ss:$16 sps:$4 sm:$0xff]   ;;  %v3659_v41 = vld [vmem:[%s5028_s3 + $0xa0] ss:$16 sps:$4 sm:$0xff]  }
  0xa0   :  { %1341 = vmatprep.subr.bf16.mxu0 %v3577_v42  ;;  %1505 = vmatprep.subr.bf16.mxu1 %v3580_v43  ;;  %v3662_v42 = vld [vmem:[%s5028_s3 + $0xa8] ss:$16 sps:$4 sm:$0xff]   ;;  %v3667_v43 = vld [vmem:[%s5028_s3 + $0xc4] ss:$16 sps:$4 sm:$0xff]  }
  0xa3   :  { %1342 = vmatpush1.bf16.msra.mxu0 %v3575_v44  ;;  %1506 = vmatpush1.bf16.msra.mxu1 %v3578_v45  ;;  %v3670_v44 = vld [vmem:[%s5028_s3 + $0xcc] ss:$16 sps:$4 sm:$0xff]   ;;  %v3665_v45 = vld [vmem:[%s5028_s3 + $0xc0] ss:$16 sps:$4 sm:$0xff]  }
  0xa4   :  { %1343 = vmatprep.subr.bf16.mxu0 %v3583_v46  ;;  %1507 = vmatprep.subr.bf16.mxu1 %v3586_v47  ;;  %v3668_v46 = vld [vmem:[%s5028_s3 + $0xc8] ss:$16 sps:$4 sm:$0xff]   ;;  %v3673_v47 = vld [vmem:[%s5028_s3 + $0xe4] ss:$16 sps:$4 sm:$0xff]  }
  0xa7   :  { %1344 = vmatpush1.bf16.msra.mxu0 %v3581_v48  ;;  %1508 = vmatpush1.bf16.msra.mxu1 %v3584_v49  ;;  %v3676_v48 = vld [vmem:[%s5028_s3 + $0xec] ss:$16 sps:$4 sm:$0xff]   ;;  %v3671_v49 = vld [vmem:[%s5028_s3 + $0xe0] ss:$16 sps:$4 sm:$0xff]  }
  0xa8   :  { %1345 = vmatprep.subr.bf16.mxu0 %v3589_v50  ;;  %1509 = vmatprep.subr.bf16.mxu1 %v3592_v51  ;;  %v3674_v50 = vld [vmem:[%s5028_s3 + $0xe8] ss:$16 sps:$4 sm:$0xff]   ;;  %v3679_v51 = vld [vmem:[%s5028_s3 + $0x104] ss:$16 sps:$4 sm:$0xff]  }
  0xab   :  { %1346 = vmatpush1.bf16.msra.mxu0 %v3587_v52  ;;  %1510 = vmatpush1.bf16.msra.mxu1 %v3590_v53  ;;  %v3682_v52 = vld [vmem:[%s5028_s3 + $0x10c] ss:$16 sps:$4 sm:$0xff]   ;;  %v3677_v53 = vld [vmem:[%s5028_s3 + $0x100] ss:$16 sps:$4 sm:$0xff]  }
  0xac   :  { %1347 = vmatprep.subr.bf16.mxu0 %v3595_v54  ;;  %1511 = vmatprep.subr.bf16.mxu1 %v3598_v55  ;;  %v3680_v54 = vld [vmem:[%s5028_s3 + $0x108] ss:$16 sps:$4 sm:$0xff]   ;;  %v3685_v55 = vld [vmem:[%s5028_s3 + $0x124] ss:$16 sps:$4 sm:$0xff]  }
  0xaf   :  { %1348 = vmatpush1.bf16.msra.mxu0 %v3593_v56  ;;  %1512 = vmatpush1.bf16.msra.mxu1 %v3596_v57  ;;  %v3688_v56 = vld [vmem:[%s5028_s3 + $0x12c] ss:$16 sps:$4 sm:$0xff]   ;;  %v3683_v57 = vld [vmem:[%s5028_s3 + $0x120] ss:$16 sps:$4 sm:$0xff]  }
  0xb0   :  { %1349 = vmatprep.subr.bf16.mxu0 %v3601_v58  ;;  %1513 = vmatprep.subr.bf16.mxu1 %v3604_v59  ;;  %v3686_v58 = vld [vmem:[%s5028_s3 + $0x128] ss:$16 sps:$4 sm:$0xff]   ;;  %v3691_v59 = vld [vmem:[%s5028_s3 + $0x144] ss:$16 sps:$4 sm:$0xff]  }
  0xb3   :  { %1350 = vmatpush1.bf16.msra.mxu0 %v3599_v60  ;;  %1514 = vmatpush1.bf16.msra.mxu1 %v3602_v61  ;;  %v3694_v60 = vld [vmem:[%s5028_s3 + $0x14c] ss:$16 sps:$4 sm:$0xff]   ;;  %v3689_v61 = vld [vmem:[%s5028_s3 + $0x140] ss:$16 sps:$4 sm:$0xff]  }
  0xb4   :  { %1351 = vmatprep.subr.bf16.mxu0 %v3607_v62  ;;  %1515 = vmatprep.subr.bf16.mxu1 %v3610_v63  ;;  %v3692_v62 = vld [vmem:[%s5028_s3 + $0x148] ss:$16 sps:$4 sm:$0xff]   ;;  %v3697_v63 = vld [vmem:[%s5028_s3 + $0x164] ss:$16 sps:$4 sm:$0xff]  }
  0xb7   :  { %1352 = vmatpush1.bf16.msra.mxu0 %v3605_v0  ;;  %1516 = vmatpush1.bf16.msra.mxu1 %v3608_v1  ;;  %v3700_v0 = vld [vmem:[%s5028_s3 + $0x16c] ss:$16 sps:$4 sm:$0xff]   ;;  %v3695_v1 = vld [vmem:[%s5028_s3 + $0x160] ss:$16 sps:$4 sm:$0xff]  }
  0xb8   :  { %1353 = vmatprep.subr.bf16.mxu0 %v3613_v2  ;;  %1517 = vmatprep.subr.bf16.mxu1 %v3616_v3  ;;  %v3698_v2 = vld [vmem:[%s5028_s3 + $0x168] ss:$16 sps:$4 sm:$0xff]   ;;  %v3703_v3 = vld [vmem:[%s5028_s3 + $0x184] ss:$16 sps:$4 sm:$0xff]  }
  0xbb   :  { %1354 = vmatpush1.bf16.msra.mxu0 %v3611_v4  ;;  %1518 = vmatpush1.bf16.msra.mxu1 %v3614_v5  ;;  %v3706_v4 = vld [vmem:[%s5028_s3 + $0x18c] ss:$16 sps:$4 sm:$0xff]   ;;  %v3701_v5 = vld [vmem:[%s5028_s3 + $0x180] ss:$16 sps:$4 sm:$0xff]  }
  0xbc   :  { %1355 = vmatprep.subr.bf16.mxu0 %v3619_v6  ;;  %1519 = vmatprep.subr.bf16.mxu1 %v3622_v7  ;;  %v3704_v6 = vld [vmem:[%s5028_s3 + $0x188] ss:$16 sps:$4 sm:$0xff]   ;;  %v3709_v7 = vld [vmem:[%s5028_s3 + $0x1a4] ss:$16 sps:$4 sm:$0xff]  }
  0xbf   :  { %1356 = vmatpush1.bf16.msra.mxu0 %v3617_v8  ;;  %1520 = vmatpush1.bf16.msra.mxu1 %v3620_v9  ;;  %v3712_v8 = vld [vmem:[%s5028_s3 + $0x1ac] ss:$16 sps:$4 sm:$0xff]   ;;  %v3707_v9 = vld [vmem:[%s5028_s3 + $0x1a0] ss:$16 sps:$4 sm:$0xff]  }
  0xc0   :  { %1366 = vmatprep.subr.bf16.mxu0 %v3625_v11  ;;  %1530 = vmatprep.subr.bf16.mxu1 %v3628_v12  ;;  %v3715_v11 = vld [vmem:[%s5028_s3 + $0x1c4] ss:$16 sps:$4 sm:$0xff]   ;;  %v3718_v12 = vld [vmem:[%s5028_s3 + $0x1cc] ss:$16 sps:$4 sm:$0xff]  }
  0xc2   :  { %1358 = vmatmul.mubr.bf16.vlgmr.msra.gmra.mrb[0].mxu0 %v38_v15  ;;  %1522 = vmatmul.mubr.bf16.vlgmr.msra.gmra.mrb[0].mxu1 %v38_v15  ;;  %v3721_v15 = vld [vmem:[%s5028_s3 + $0x1e4] ss:$16 sps:$4 sm:$0xff]  }
  0xc3   :  { %1367 = vmatpush1.bf16.msra.mxu0 %v3623_v13  ;;  %1531 = vmatpush1.bf16.msra.mxu1 %v3626_v14  ;;  %v3713_v13 = vld [vmem:[%s5028_s3 + $0x1c0] ss:$16 sps:$4 sm:$0xff]   ;;  %v3716_v14 = vld [vmem:[%s5028_s3 + $0x1c8] ss:$16 sps:$4 sm:$0xff]  }
  0xc4   :  { %1398 = vmatprep.mubr.bf16.mxu0 %v3853_v18  ;;  %1562 = vmatprep.mubr.bf16.mxu1 %v3853_v18  ;;  %v3722_v18 = vld [vmem:[%s5028_s3 + $0x1e8] ss:$16 sps:$4 sm:$0xff]  }
  0xc5   :  { %2369 = vmatprep.subr.bf16.mxu0 %v3631_v16  ;;  %2451 = vmatprep.subr.bf16.mxu1 %v3634_v17  ;;  %v3724_v16 = vld [vmem:[%s5028_s3 + $0x1ec] ss:$16 sps:$4 sm:$0xff]   ;;  %v3719_v17 = vld [vmem:[%s5028_s3 + $0x1e0] ss:$16 sps:$4 sm:$0xff]  }
  0xce   :  { %3087 = vmatmul.mubr.msk.bf16.vlgmr.msra.gmra.mrb[0].mxu0 %vm1239_vm0, %v40_v20  ;;  %3088 = vmatmul.mubr.msk.bf16.vlgmr.msra.gmra.mrb[0].mxu1 %vm1239_vm0, %v40_v20  ;;  %v3730_v20 = vld [vmem:[%s5028_s3 + $0x20c] ss:$16 sps:$4 sm:$0xff]  }
  0xcf   :  { %2370 = vmatpush1.bf16.msra.mxu0 %v3629_v21  ;;  %2452 = vmatpush1.bf16.msra.mxu1 %v3632_v22  ;;  %v239_v21 = vlaneseq }
  0xd0   :  { %2371 = vmatprep.subr.bf16.mxu0 %v3637_v23  ;;  %2453 = vmatprep.subr.bf16.mxu1 %v3640_v24  ;;  %v4707_v24 = vld [vmem:[%s5030_s2] sm:$0xf] }
  0xd1   :  { %v4701_v22 = vshrl.u32 %v239_v21, 7  ;;  %v3787_v21 = vld [vmem:[%s5028_s3 + $0x344] ss:$16 sps:$4 sm:$0xff]  }
  0xd3   :  { %2372 = vmatpush1.bf16.msra.mxu0 %v3635_v25  ;;  %2454 = vmatpush1.bf16.msra.mxu1 %v3638_v26  ;;  %v241_v23 = vsub.s32 0, %v4701_v22  ;;  %v245_v25 = vsub.s32 1, %v4701_v22  ;;  %v253_v26 = vsub.s32 3, %v4701_v22 }
  0xd4   :  { %2373 = vmatprep.subr.bf16.mxu0 %v3643_v27  ;;  %2455 = vmatprep.subr.bf16.mxu1 %v3646_v28 }
  0xd5   :  { %v242_v27 = vrot.slane %v4707_v24, %v241_v23  ;;  %v246_v28 = vrot.slane %v4707_v24, %v245_v25 }
  0xd7   :  { %2374 = vmatpush1.bf16.msra.mxu0 %v3641_v29  ;;  %2456 = vmatpush1.bf16.msra.mxu1 %v3644_v30  ;;  %v254_v29 = vrot.slane %v4707_v24, %v253_v26 }
  0xd8   :  { %2375 = vmatprep.subr.bf16.mxu0 %v3649_v31  ;;  %2457 = vmatprep.subr.bf16.mxu1 %v3652_v32 }
  0xdb   :  { %2376 = vmatpush1.bf16.msra.mxu0 %v3647_v33  ;;  %2458 = vmatpush1.bf16.msra.mxu1 %v3650_v34 }
  0xdc   :  { %2377 = vmatprep.subr.bf16.mxu0 %v3655_v35  ;;  %2459 = vmatprep.subr.bf16.mxu1 %v3658_v36 }
  0xdf   :  { %2378 = vmatpush1.bf16.msra.mxu0 %v3653_v37  ;;  %2460 = vmatpush1.bf16.msra.mxu1 %v3656_v38 }
  0xe0   :  { %2379 = vmatprep.subr.bf16.mxu0 %v3661_v39  ;;  %2461 = vmatprep.subr.bf16.mxu1 %v3664_v40 }
  0xe3   :  { %2380 = vmatpush1.bf16.msra.mxu0 %v3659_v41  ;;  %2462 = vmatpush1.bf16.msra.mxu1 %v3662_v42 }
  0xe4   :  { %2381 = vmatprep.subr.bf16.mxu0 %v3667_v43  ;;  %2463 = vmatprep.subr.bf16.mxu1 %v3670_v44 }
  0xe7   :  { %2382 = vmatpush1.bf16.msra.mxu0 %v3665_v45  ;;  %2464 = vmatpush1.bf16.msra.mxu1 %v3668_v46  ;;  %v3725_v45 = vld [vmem:[%s5028_s3 + $0x200] ss:$16 sps:$4 sm:$0xff]   ;;  %v3728_v46 = vld [vmem:[%s5028_s3 + $0x208] ss:$16 sps:$4 sm:$0xff]  }
  0xe8   :  { %2383 = vmatprep.subr.bf16.mxu0 %v3673_v47  ;;  %2465 = vmatprep.subr.bf16.mxu1 %v3676_v48  ;;  %v3733_v48 = vld [vmem:[%s5028_s3 + $0x224] ss:$16 sps:$4 sm:$0xff]  }
  0xeb   :  { %2384 = vmatpush1.bf16.msra.mxu0 %v3671_v49  ;;  %2466 = vmatpush1.bf16.msra.mxu1 %v3674_v50  ;;  %v3736_v49 = vld [vmem:[%s5028_s3 + $0x22c] ss:$16 sps:$4 sm:$0xff]  }
  0xec   :  { %2385 = vmatprep.subr.bf16.mxu0 %v3679_v51  ;;  %2467 = vmatprep.subr.bf16.mxu1 %v3682_v52  ;;  %v3731_v51 = vld [vmem:[%s5028_s3 + $0x220] ss:$16 sps:$4 sm:$0xff]   ;;  %v3734_v52 = vld [vmem:[%s5028_s3 + $0x228] ss:$16 sps:$4 sm:$0xff]  }
  0xef   :  { %2386 = vmatpush1.bf16.msra.mxu0 %v3677_v53  ;;  %2468 = vmatpush1.bf16.msra.mxu1 %v3680_v54  ;;  %v3739_v53 = vld [vmem:[%s5028_s3 + $0x244] ss:$16 sps:$4 sm:$0xff]   ;;  %v3742_v54 = vld [vmem:[%s5028_s3 + $0x24c] ss:$16 sps:$4 sm:$0xff]  }
  0xf0   :  { %2387 = vmatprep.subr.bf16.mxu0 %v3685_v55  ;;  %2469 = vmatprep.subr.bf16.mxu1 %v3688_v56  ;;  %v3737_v55 = vld [vmem:[%s5028_s3 + $0x240] ss:$16 sps:$4 sm:$0xff]   ;;  %v3740_v56 = vld [vmem:[%s5028_s3 + $0x248] ss:$16 sps:$4 sm:$0xff]  }
  0xf3   :  { %2388 = vmatpush1.bf16.msra.mxu0 %v3683_v57  ;;  %2470 = vmatpush1.bf16.msra.mxu1 %v3686_v58  ;;  %v3745_v57 = vld [vmem:[%s5028_s3 + $0x264] ss:$16 sps:$4 sm:$0xff]   ;;  %v3748_v58 = vld [vmem:[%s5028_s3 + $0x26c] ss:$16 sps:$4 sm:$0xff]  }
  0xf4   :  { %2389 = vmatprep.subr.bf16.mxu0 %v3691_v59  ;;  %2471 = vmatprep.subr.bf16.mxu1 %v3694_v60  ;;  %v3743_v59 = vld [vmem:[%s5028_s3 + $0x260] ss:$16 sps:$4 sm:$0xff]   ;;  %v3746_v60 = vld [vmem:[%s5028_s3 + $0x268] ss:$16 sps:$4 sm:$0xff]  }
  0xf7   :  { %2390 = vmatpush1.bf16.msra.mxu0 %v3689_v61  ;;  %2472 = vmatpush1.bf16.msra.mxu1 %v3692_v62  ;;  %v3751_v61 = vld [vmem:[%s5028_s3 + $0x284] ss:$16 sps:$4 sm:$0xff]   ;;  %v3754_v62 = vld [vmem:[%s5028_s3 + $0x28c] ss:$16 sps:$4 sm:$0xff]  }
  0xf8   :  { %2391 = vmatprep.subr.bf16.mxu0 %v3697_v63  ;;  %2473 = vmatprep.subr.bf16.mxu1 %v3700_v0  ;;  %v3749_v63 = vld [vmem:[%s5028_s3 + $0x280] ss:$16 sps:$4 sm:$0xff]   ;;  %v3752_v0 = vld [vmem:[%s5028_s3 + $0x288] ss:$16 sps:$4 sm:$0xff]  }
  0xfb   :  { %2392 = vmatpush1.bf16.msra.mxu0 %v3695_v1  ;;  %2474 = vmatpush1.bf16.msra.mxu1 %v3698_v2  ;;  %v3757_v1 = vld [vmem:[%s5028_s3 + $0x2a4] ss:$16 sps:$4 sm:$0xff]   ;;  %v3760_v2 = vld [vmem:[%s5028_s3 + $0x2ac] ss:$16 sps:$4 sm:$0xff]  }
  0xfc   :  { %2393 = vmatprep.subr.bf16.mxu0 %v3703_v3  ;;  %2475 = vmatprep.subr.bf16.mxu1 %v3706_v4  ;;  %v3755_v3 = vld [vmem:[%s5028_s3 + $0x2a0] ss:$16 sps:$4 sm:$0xff]   ;;  %v3758_v4 = vld [vmem:[%s5028_s3 + $0x2a8] ss:$16 sps:$4 sm:$0xff]  }
  0xff   :  { %2394 = vmatpush1.bf16.msra.mxu0 %v3701_v5  ;;  %2476 = vmatpush1.bf16.msra.mxu1 %v3704_v6  ;;  %v3763_v5 = vld [vmem:[%s5028_s3 + $0x2c4] ss:$16 sps:$4 sm:$0xff]   ;;  %v3766_v6 = vld [vmem:[%s5028_s3 + $0x2cc] ss:$16 sps:$4 sm:$0xff]  }
 0x100   :  { %2395 = vmatprep.subr.bf16.mxu0 %v3709_v7  ;;  %2477 = vmatprep.subr.bf16.mxu1 %v3712_v8  ;;  %v3761_v7 = vld [vmem:[%s5028_s3 + $0x2c0] ss:$16 sps:$4 sm:$0xff]   ;;  %v3764_v8 = vld [vmem:[%s5028_s3 + $0x2c8] ss:$16 sps:$4 sm:$0xff]  }
 0x103   :  { %2396 = vmatpush1.bf16.msra.mxu0 %v3707_v9  ;;  %2478 = vmatpush1.bf16.msra.mxu1 %v3710_v10  ;;  %v3769_v9 = vld [vmem:[%s5028_s3 + $0x2e4] ss:$16 sps:$4 sm:$0xff]   ;;  %v3772_v10 = vld [vmem:[%s5028_s3 + $0x2ec] ss:$16 sps:$4 sm:$0xff]  }
 0x104   :  { %2397 = vmatprep.subr.bf16.mxu0 %v3715_v11  ;;  %2479 = vmatprep.subr.bf16.mxu1 %v3718_v12  ;;  %v3767_v11 = vld [vmem:[%s5028_s3 + $0x2e0] ss:$16 sps:$4 sm:$0xff]   ;;  %v3770_v12 = vld [vmem:[%s5028_s3 + $0x2e8] ss:$16 sps:$4 sm:$0xff]  }
 0x107   :  { %2398 = vmatpush1.bf16.msra.mxu0 %v3713_v13  ;;  %2480 = vmatpush1.bf16.msra.mxu1 %v3716_v14  ;;  %v3775_v13 = vld [vmem:[%s5028_s3 + $0x304] ss:$16 sps:$4 sm:$0xff]   ;;  %v3778_v14 = vld [vmem:[%s5028_s3 + $0x30c] ss:$16 sps:$4 sm:$0xff]  }
 0x108   :  { %2399 = vmatprep.subr.bf16.mxu0 %v3721_v15  ;;  %2481 = vmatprep.subr.bf16.mxu1 %v3724_v16  ;;  %v3773_v15 = vld [vmem:[%s5028_s3 + $0x300] ss:$16 sps:$4 sm:$0xff]   ;;  %v3776_v16 = vld [vmem:[%s5028_s3 + $0x308] ss:$16 sps:$4 sm:$0xff]  }
 0x10b   :  { %2400 = vmatpush1.bf16.msra.mxu0 %v3719_v17  ;;  %2482 = vmatpush1.bf16.msra.mxu1 %v3722_v18  ;;  %v3781_v17 = vld [vmem:[%s5028_s3 + $0x324] ss:$16 sps:$4 sm:$0xff]   ;;  %v3784_v18 = vld [vmem:[%s5028_s3 + $0x32c] ss:$16 sps:$4 sm:$0xff]  }
 0x10c   :  { %2410 = vmatprep.subr.bf16.mxu0 %v3727_v19  ;;  %2492 = vmatprep.subr.bf16.mxu1 %v3730_v20  ;;  %v3779_v19 = vld [vmem:[%s5028_s3 + $0x320] ss:$16 sps:$4 sm:$0xff]   ;;  %v3782_v20 = vld [vmem:[%s5028_s3 + $0x328] ss:$16 sps:$4 sm:$0xff]  }
 0x1a1   :  { %v1400_v30 = vpop.f32.mrb[0].mxu0  ;;  %v4720_v31 = vpop.f32.mrb[0].mxu1 }
 0x1a2   :  { %v3294_v32 = vadd.f32 %v1400_v30, %v242_v27  ;;  %v1402_v33 = vpop.f32.mrb[1].mxu0  ;;  %v1566_v34 = vpop.f32.mrb[1].mxu1  ;;  %v3790_v27 = vld [vmem:[%s5028_s3 + $0x34c] ss:$16 sps:$4 sm:$0xff]   ;;  %v3793_v30 = vld [vmem:[%s5028_s3 + $0x364] ss:$16 sps:$4 sm:$0xff]  }
 0x1a3   :  { %v3295_v35 = vadd.f32 %v1402_v33, %v246_v28  ;;  %v3297_v36 = vadd.f32 %v1566_v34, %v254_v29  ;;  %v1404_v37 = vpop.f32.mrb[2].mxu0  ;;  %v1568_v38 = vpop.f32.mrb[2].mxu1  ;;  %v3785_v28 = vld [vmem:[%s5028_s3 + $0x340] ss:$16 sps:$4 sm:$0xff]   ;;  %v3788_v29 = vld [vmem:[%s5028_s3 + $0x348] ss:$16 sps:$4 sm:$0xff]  }
 0x1a4   :  { %v1571_v39 = vmax.f32 %v3294_v32, 0.0  ;;  %v1405_v40 = vpop.f32.mrb[3].mxu0  ;;  %v1569_v41 = vpop.f32.mrb[3].mxu1  ;;  %v3796_v32 = vld [vmem:[%s5028_s3 + $0x36c] ss:$16 sps:$4 sm:$0xff]  }
 0x1a5   :  { %v1572_v42 = vmax.f32 %v3295_v35, 0.0  ;;  %v1574_v43 = vmax.f32 %v3297_v36, 0.0  ;;  %v3791_v33 = vld [vmem:[%s5028_s3 + $0x360] ss:$16 sps:$4 sm:$0xff]   ;;  %v3794_v34 = vld [vmem:[%s5028_s3 + $0x368] ss:$16 sps:$4 sm:$0xff]  }
 0x1a6   :  { %v1575_v47 = vpack.c.bf16 %v1571_v39, %v1571_v39  ;;  %v3799_v35 = vld [vmem:[%s5028_s3 + $0x384] ss:$16 sps:$4 sm:$0xff]   ;;  %v3802_v36 = vld [vmem:[%s5028_s3 + $0x38c] ss:$16 sps:$4 sm:$0xff]   ;;  %v3797_v37 = vld [vmem:[%s5028_s3 + $0x380] ss:$16 sps:$4 sm:$0xff]  }
 0x1a7   :  { %v1576_v44 = vpack.c.bf16 %v1572_v42, %v1572_v42  ;;  %v1578_v50 = vpack.c.bf16 %v1574_v43, %v1574_v43  ;;  %v3800_v38 = vld [vmem:[%s5028_s3 + $0x388] ss:$16 sps:$4 sm:$0xff]   ;;  %v249_v39 = vsub.s32 2, %v4701_v22  ;;  %v3805_v40 = vld [vmem:[%s5028_s3 + $0x3a4] ss:$16 sps:$4 sm:$0xff]  }
 0x1a8   :  { %v3808_v41 = vld [vmem:[%s5028_s3 + $0x3ac] ss:$16 sps:$4 sm:$0xff]   ;;  %v3803_v42 = vld [vmem:[%s5028_s3 + $0x3a0] ss:$16 sps:$4 sm:$0xff]   ;;  %v3806_v43 = vld [vmem:[%s5028_s3 + $0x3a8] ss:$16 sps:$4 sm:$0xff]  }
 0x1a9   :  { %2401 = vmatprep.mubr.bf16.mxu0 %v1576_v44  ;;  %2483 = vmatprep.mubr.bf16.mxu1 %v1576_v44  ;;  %v250_v44 = vrot.slane %v4707_v24, %v249_v39  ;;  %v3812_v24 = vld [vmem:[%s5028_s3 + $0x3c8] ss:$16 sps:$4 sm:$0xff]  }
 0x1aa   :  { %2402 = vmatmul.mubr.bf16.vlgmr.msra.gmra.mrb[4].mxu0 %v1575_v47  ;;  %2484 = vmatmul.mubr.bf16.vlgmr.msra.gmra.mrb[4].mxu1 %v1575_v47  ;;  %v3809_v47 = vld [vmem:[%s5028_s3 + $0x3c0] ss:$16 sps:$4 sm:$0xff]  }
 0x1ab   :  { %2411 = vmatpush1.bf16.msra.mxu0 %v3725_v45  ;;  %2493 = vmatpush1.bf16.msra.mxu1 %v3728_v46  ;;  %v3811_v45 = vld [vmem:[%s5028_s3 + $0x3c4] ss:$16 sps:$4 sm:$0xff]   ;;  %v3814_v46 = vld [vmem:[%s5028_s3 + $0x3cc] ss:$16 sps:$4 sm:$0xff]  }
 0x1ac   :  { %2442 = vmatprep.mubr.bf16.mxu0 %v1578_v50  ;;  %2524 = vmatprep.mubr.bf16.mxu1 %v1578_v50  ;;  %v3820_v50 = vld [vmem:[%s5028_s3 + $0x3ec] ss:$16 sps:$4 sm:$0xff]  }
 0x1ad   :  { %2412 = vmatprep.subr.bf16.mxu0 %v3733_v48  ;;  %2494 = vmatprep.subr.bf16.mxu1 %v3736_v49  ;;  %v3296_v48 = vadd.f32 %v4720_v31, %v250_v44  ;;  %v3817_v49 = vld [vmem:[%s5028_s3 + $0x3e4] ss:$16 sps:$4 sm:$0xff]   ;;  %v3818_v31 = vld [vmem:[%s5028_s3 + $0x3e8] ss:$16 sps:$4 sm:$0xff]  }
 0x1af   :  { %2413 = vmatpush1.bf16.msra.mxu0 %v3731_v51  ;;  %2495 = vmatpush1.bf16.msra.mxu1 %v3734_v52  ;;  %v3815_v51 = vld [vmem:[%s5028_s3 + $0x3e0] ss:$16 sps:$4 sm:$0xff]   ;;  %v1573_v52 = vmax.f32 %v3296_v48, 0.0 }
 0x1b0   :  { %2414 = vmatprep.subr.bf16.mxu0 %v3739_v53  ;;  %2496 = vmatprep.subr.bf16.mxu1 %v3742_v54  ;;  %v3821_v53 = vld [vmem:[%s5029_s5 + $0x40] sm:$0xff]  }
 0x1b1   :  { %v3822_v54 = vld [vmem:[%s5029_s5 + $0xc0] sm:$0xff]  }
 0x1b3   :  { %2415 = vmatpush1.bf16.msra.mxu0 %v3737_v55  ;;  %2497 = vmatpush1.bf16.msra.mxu1 %v3740_v56  ;;  %v3823_v55 = vld [vmem:[%s5029_s5] sm:$0xff]  }
 0x1b4   :  { %2416 = vmatprep.subr.bf16.mxu0 %v3745_v57  ;;  %2498 = vmatprep.subr.bf16.mxu1 %v3748_v58  ;;  %v3824_v56 = vld [vmem:[%s5029_s5 + $0x80] sm:$0xff]   ;;  %v1577_v57 = vpack.c.bf16 %v1573_v52, %v1573_v52  ;;  %v3825_v58 = vld [vmem:[%s5029_s5 + $0x48] sm:$0xff]  }
 0x1b7   :  { %2417 = vmatpush1.bf16.msra.mxu0 %v3743_v59  ;;  %2499 = vmatpush1.bf16.msra.mxu1 %v3746_v60  ;;  %v3826_v59 = vld [vmem:[%s5029_s5 + $0xc8] sm:$0xff]  }
 0x1b8   :  { %2418 = vmatprep.subr.bf16.mxu0 %v3751_v61  ;;  %2500 = vmatprep.subr.bf16.mxu1 %v3754_v62  ;;  %v3827_v60 = vld [vmem:[%s5029_s5 + $0x8] sm:$0xff]   ;;  %v3829_v62 = vld [vmem:[%s5029_s5 + $0x50] sm:$0xff]  }
 0x1b9   :  { %v3828_v61 = vld [vmem:[%s5029_s5 + $0x88] sm:$0xff]  }
 0x1bb   :  { %2419 = vmatpush1.bf16.msra.mxu0 %v3749_v63  ;;  %2501 = vmatpush1.bf16.msra.mxu1 %v3752_v0  ;;  %v3830_v63 = vld [vmem:[%s5029_s5 + $0xd0] sm:$0xff]  }
 0x1bc   :  { %2420 = vmatprep.subr.bf16.mxu0 %v3757_v1  ;;  %2502 = vmatprep.subr.bf16.mxu1 %v3760_v2  ;;  %v3831_v0 = vld [vmem:[%s5029_s5 + $0x10] sm:$0xff]   ;;  %v3833_v2 = vld [vmem:[%s5029_s5 + $0x58] sm:$0xff]  }
 0x1bd   :  { %v3832_v1 = vld [vmem:[%s5029_s5 + $0x90] sm:$0xff]  }
 0x1bf   :  { %2421 = vmatpush1.bf16.msra.mxu0 %v3755_v3  ;;  %2503 = vmatpush1.bf16.msra.mxu1 %v3758_v4  ;;  %v3834_v3 = vld [vmem:[%s5029_s5 + $0xd8] sm:$0xff]  }
 0x1c0   :  { %2422 = vmatprep.subr.bf16.mxu0 %v3763_v5  ;;  %2504 = vmatprep.subr.bf16.mxu1 %v3766_v6  ;;  %v3835_v4 = vld [vmem:[%s5029_s5 + $0x18] sm:$0xff]   ;;  %v3837_v6 = vld [vmem:[%s5029_s5 + $0x60] sm:$0xff]  }
 0x1c1   :  { %v3836_v5 = vld [vmem:[%s5029_s5 + $0x98] sm:$0xff]  }
 0x1c3   :  { %2423 = vmatpush1.bf16.msra.mxu0 %v3761_v7  ;;  %2505 = vmatpush1.bf16.msra.mxu1 %v3764_v8  ;;  %v3838_v7 = vld [vmem:[%s5029_s5 + $0xe0] sm:$0xff]  }
 0x1c4   :  { %2424 = vmatprep.subr.bf16.mxu0 %v3769_v9  ;;  %2506 = vmatprep.subr.bf16.mxu1 %v3772_v10  ;;  %v3839_v8 = vld [vmem:[%s5029_s5 + $0x20] sm:$0xff]   ;;  %v3841_v10 = vld [vmem:[%s5029_s5 + $0x68] sm:$0xff]  }
 0x1c5   :  { %v3840_v9 = vld [vmem:[%s5029_s5 + $0xa0] sm:$0xff]  }
 0x1c7   :  { %2425 = vmatpush1.bf16.msra.mxu0 %v3767_v11  ;;  %2507 = vmatpush1.bf16.msra.mxu1 %v3770_v12  ;;  %v3842_v11 = vld [vmem:[%s5029_s5 + $0xe8] sm:$0xff]  }
 0x1c8   :  { %2426 = vmatprep.subr.bf16.mxu0 %v3775_v13  ;;  %2508 = vmatprep.subr.bf16.mxu1 %v3778_v14  ;;  %v3843_v12 = vld [vmem:[%s5029_s5 + $0x28] sm:$0xff]   ;;  %v3845_v14 = vld [vmem:[%s5029_s5 + $0x70] sm:$0xff]  }
 0x1c9   :  { %v3844_v13 = vld [vmem:[%s5029_s5 + $0xa8] sm:$0xff]  }
 0x1cb   :  { %2427 = vmatpush1.bf16.msra.mxu0 %v3773_v15  ;;  %2509 = vmatpush1.bf16.msra.mxu1 %v3776_v16  ;;  %v3846_v15 = vld [vmem:[%s5029_s5 + $0xf0] sm:$0xff]  }
 0x1cc   :  { %2428 = vmatprep.subr.bf16.mxu0 %v3781_v17  ;;  %2510 = vmatprep.subr.bf16.mxu1 %v3784_v18  ;;  %v3847_v16 = vld [vmem:[%s5029_s5 + $0x30] sm:$0xff]   ;;  %v3849_v18 = vld [vmem:[%s5029_s5 + $0x78] sm:$0xff]  }
 0x1cd   :  { %v3848_v17 = vld [vmem:[%s5029_s5 + $0xb0] sm:$0xff]  }
 0x1cf   :  { %2429 = vmatpush1.bf16.msra.mxu0 %v3779_v19  ;;  %2511 = vmatpush1.bf16.msra.mxu1 %v3782_v20  ;;  %v3850_v19 = vld [vmem:[%s5029_s5 + $0xf8] sm:$0xff]  }
 0x1d0   :  { %2430 = vmatprep.subr.bf16.mxu0 %v3787_v21  ;;  %2512 = vmatprep.subr.bf16.mxu1 %v3790_v27  ;;  %v3851_v20 = vld [vmem:[%s5029_s5 + $0x38] sm:$0xff]   ;;  %v1707_v27 = vld [vmem:[%s5031_s4] sm:$0xf] }
 0x1d1   :  { %v3852_v21 = vld [vmem:[%s5029_s5 + $0xb8] sm:$0xff]  }
 0x1d3   :  { %2431 = vmatpush1.bf16.msra.mxu0 %v3785_v28  ;;  %2513 = vmatpush1.bf16.msra.mxu1 %v3788_v29  ;;  %v1712_v28 = vrot.slane %v1707_v27, %v241_v23  ;;  %v1720_v29 = vrot.slane %v1707_v27, %v249_v39 }
 0x1d4   :  { %2432 = vmatprep.subr.bf16.mxu0 %v3793_v30  ;;  %2514 = vmatprep.subr.bf16.mxu1 %v3796_v32  ;;  %v1716_v30 = vrot.slane %v1707_v27, %v245_v25  ;;  %v1724_v32 = vrot.slane %v1707_v27, %v253_v26 }
 0x1d7   :  { %2433 = vmatpush1.bf16.msra.mxu0 %v3791_v33  ;;  %2515 = vmatpush1.bf16.msra.mxu1 %v3794_v34 }
 0x1d8   :  { %2434 = vmatprep.subr.bf16.mxu0 %v3799_v35  ;;  %2516 = vmatprep.subr.bf16.mxu1 %v3802_v36 }
 0x1db   :  { %2435 = vmatpush1.bf16.msra.mxu0 %v3797_v37  ;;  %2517 = vmatpush1.bf16.msra.mxu1 %v3800_v38 }
 0x1dc   :  { %2436 = vmatprep.subr.bf16.mxu0 %v3805_v40  ;;  %2518 = vmatprep.subr.bf16.mxu1 %v3808_v41 }
 0x1df   :  { %2437 = vmatpush1.bf16.msra.mxu0 %v3803_v42  ;;  %2519 = vmatpush1.bf16.msra.mxu1 %v3806_v43 }
 0x1e0   :  { %2438 = vmatprep.subr.bf16.mxu0 %v3811_v45  ;;  %2520 = vmatprep.subr.bf16.mxu1 %v3814_v46 }
 0x1e3   :  { %2439 = vmatpush1.bf16.msra.mxu0 %v3809_v47  ;;  %2521 = vmatpush1.bf16.msra.mxu1 %v3812_v24 }
 0x1e4   :  { %2440 = vmatprep.subr.bf16.mxu0 %v3817_v49  ;;  %2522 = vmatprep.subr.bf16.mxu1 %v3820_v50  ;;  %v3217_v50 = vld [vmem:[%s5032_s6] ss:$0 sm:$0xff] }
 0x1e7   :  { %2441 = vmatpush1.bf16.msra.mxu0 %v3815_v51  ;;  %2523 = vmatpush1.bf16.msra.mxu1 %v3818_v31 }
 0x1e8   :  { %3250 = vmatprep.subr.bf16.mxu0 %v3821_v53  ;;  %3272 = vmatprep.subr.bf16.mxu1 %v3822_v54 }
 0x1ea   :  { %2443 = vmatmul.mubr.bf16.vlgmr.msra.gmra.mrb[4].mxu0 %v1577_v57  ;;  %2525 = vmatmul.mubr.bf16.vlgmr.msra.gmra.mrb[4].mxu1 %v1577_v57 }
 0x1eb   :  { %3251 = vmatpush3.bf16.msra.mxu0 %v3823_v55  ;;  %3273 = vmatpush3.bf16.msra.mxu1 %v3824_v56 }
 0x1ec   :  { %3252 = vmatprep.subr.bf16.mxu0 %v3825_v58  ;;  %3274 = vmatprep.subr.bf16.mxu1 %v3826_v59 }
 0x1ef   :  { %3253 = vmatpush3.bf16.msra.mxu0 %v3827_v60  ;;  %3275 = vmatpush3.bf16.msra.mxu1 %v3828_v61 }
 0x1f0   :  { %3254 = vmatprep.subr.bf16.mxu0 %v3829_v62  ;;  %3276 = vmatprep.subr.bf16.mxu1 %v3830_v63 }
 0x1f3   :  { %3255 = vmatpush3.bf16.msra.mxu0 %v3831_v0  ;;  %3277 = vmatpush3.bf16.msra.mxu1 %v3832_v1 }
 0x1f4   :  { %3256 = vmatprep.subr.bf16.mxu0 %v3833_v2  ;;  %3278 = vmatprep.subr.bf16.mxu1 %v3834_v3 }
 0x1f7   :  { %3257 = vmatpush3.bf16.msra.mxu0 %v3835_v4  ;;  %3279 = vmatpush3.bf16.msra.mxu1 %v3836_v5 }
 0x1f8   :  { %3258 = vmatprep.subr.bf16.mxu0 %v3837_v6  ;;  %3280 = vmatprep.subr.bf16.mxu1 %v3838_v7 }
 0x1fb   :  { %3259 = vmatpush3.bf16.msra.mxu0 %v3839_v8  ;;  %3281 = vmatpush3.bf16.msra.mxu1 %v3840_v9 }
 0x1fc   :  { %3260 = vmatprep.subr.bf16.mxu0 %v3841_v10  ;;  %3282 = vmatprep.subr.bf16.mxu1 %v3842_v11 }
 0x1ff   :  { %3261 = vmatpush3.bf16.msra.mxu0 %v3843_v12  ;;  %3283 = vmatpush3.bf16.msra.mxu1 %v3844_v13 }
 0x200   :  { %3262 = vmatprep.subr.bf16.mxu0 %v3845_v14  ;;  %3284 = vmatprep.subr.bf16.mxu1 %v3846_v15 }
 0x203   :  { %3263 = vmatpush3.bf16.msra.mxu0 %v3847_v16  ;;  %3285 = vmatpush3.bf16.msra.mxu1 %v3848_v17 }
 0x204   :  { %3264 = vmatprep.subr.bf16.mxu0 %v3849_v18  ;;  %3286 = vmatprep.subr.bf16.mxu1 %v3850_v19 }
 0x207   :  { %3265 = vmatpush3.bf16.msra.mxu0 %v3851_v20  ;;  %3287 = vmatpush3.bf16.msra.mxu1 %v3852_v21 }
 0x2bd   :  { %v2444_v33 = vpop.f32.mrb[4].mxu0  ;;  %v2526_v34 = vpop.f32.mrb[4].mxu1 }
 0x2be   :  { %v3298_v35 = vadd.f32 %v2444_v33, %v1712_v28  ;;  %v3300_v36 = vadd.f32 %v2526_v34, %v1720_v29  ;;  %v2446_v37 = vpop.f32.mrb[5].mxu0  ;;  %v2528_v38 = vpop.f32.mrb[5].mxu1 }
 0x2bf   :  { %v3299_v40 = vadd.f32 %v2446_v37, %v1716_v30  ;;  %v3301_v41 = vadd.f32 %v2528_v38, %v1724_v32  ;;  %v2448_v42 = vpop.f32.mrb[6].mxu0  ;;  %v2530_v43 = vpop.f32.mrb[6].mxu1 }
 0x2c0   :  { %v2533_v23 = vmax.f32 %v3298_v35, 0.0  ;;  %v2535_v44 = vmax.f32 %v3300_v36, 0.0  ;;  %v2449_v45 = vpop.f32.mrb[7].mxu0  ;;  %v2531_v39 = vpop.f32.mrb[7].mxu1 }
 0x2c1   :  { %v2534_v46 = vmax.f32 %v3299_v40, 0.0  ;;  %v2536_v47 = vmax.f32 %v3301_v41, 0.0 }
 0x2c2   :  { %v2537_v22 = vpack.c.bf16 %v2533_v23, %v2533_v23  ;;  %v2539_v26 = vpack.c.bf16 %v2535_v44, %v2535_v44 }
 0x2c3   :  { %v2538_v25 = vpack.c.bf16 %v2534_v46, %v2534_v46  ;;  %v2540_v24 = vpack.c.bf16 %v2536_v47, %v2536_v47 }
 0x2c5   :  { %2836 = vmatprep.mubr.bf16.mxu0 %v2538_v25  ;;  %2876 = vmatprep.mubr.bf16.mxu1 %v2540_v24 }
 0x2c6   :  { %2837 = vmatmul.mubr.bf16.vlgmr.msra.gmra.mrb[8].mxu0 %v2537_v22  ;;  %2877 = vmatmul.mubr.bf16.vlgmr.msra.gmra.mrb[8].mxu1 %v2539_v26 }
 0x399   :  { %v3266_v48 = vpop.f32.mrb[8].mxu0  ;;  %v3288_v49 = vpop.f32.mrb[8].mxu1 }
 0x39a   :  { %v3267_v51 = vpop.f32.mrb[9].mxu0  ;;  %v3289_v31 = vpop.f32.mrb[9].mxu1 }
 0x39b   :  { %v3268_v52 = vadd.f32 %v3267_v51, %v3266_v48  ;;  %v3290_v53 = vadd.f32 %v3289_v31, %v3288_v49  ;;  %v3269_v54 = vpop.f32.mrb[10].mxu0  ;;  %v3291_v55 = vpop.f32.mrb[10].mxu1 }
 0x39c   :  { %v3270_v56 = vpop.f32.mrb[11].mxu0  ;;  %v3292_v57 = vpop.f32.mrb[11].mxu1 }
 0x39d   :  { %v2839_v58 = vadd.f32 %v3268_v52, %v3217_v50 }
 0x39f   :  { %v2879_v59 = vadd.f32 %v3290_v53, %v2839_v58 }
 0x3a1   :  { %v2884_v60 = vmax.f32 %v2879_v59, 0.0 }
 0x3a3   :  { %v2885_v61 = vpack.c.bf16 %v2884_v60, %v2884_v60 }
 0x3a5   :  { %2886 = vst [vmem:[%s5033_s7] sm:$0xf] %v2885_v61 }

</bundles_post_ra>
